<compile_context>
chip_gen: v6e
topology: v6e:2x2x1
jax: 0.10.0
libtpu: 0.0.40
codegen_flags: <defaults>
</compile_context>

<pallas_src>
import functools
import math

import jax
import jax.numpy as jnp
from jax import lax
from jax.experimental import pallas as pl
from jax.experimental.pallas import tpu as pltpu


# --------------------------------- fused kernel --------------------------------- #

def _fused_forward_kernel(
        src_ref, pe_ref, emb_w_ref, emb_b_ref,
        w_in_ref, b_in_ref, w_out_ref, w_ff1_ref, w_ff2_ref, small_ref,
        head_w_ref, head_b_ref,
        out_ref,
        x_res, mem_res,
        *, nhead, eps, cont_len, bin_len):
    l = pl.program_id(1)
    num_layers = pl.num_programs(1)
    S, D = x_res.shape
    Dh = D // nhead
    scale = 1.0 / math.sqrt(Dh)
    F = w_ff1_ref.shape[2]

    # ---- first layer step of each batch row: embedding + positional encoding ----
    # (Reproduces the module's PE quirk: pe buffer is (max_len, 1, d_model) and x is
    #  batch-first, so pe[:x.size(0)] indexes by BATCH and broadcasts over the sequence.)
    @pl.when(l == 0)
    def _embed():
        e = jnp.dot(src_ref[0].astype(jnp.bfloat16), emb_w_ref[...],
                    preferred_element_type=jnp.float32)
        e = e + emb_b_ref[...] + pe_ref[0]
        x_res[...] = e
        mem_res[...] = e

    # Causal mask generated in-kernel (used as tgt_mask AND memory_mask, as in forward()).
    rows = lax.broadcasted_iota(jnp.int32, (1, S, S), 1)
    cols = lax.broadcasted_iota(jnp.int32, (1, S, S), 2)
    causal = cols > rows

    small = small_ref[0]  # (16, 128) f32 packed LN gamma/beta + out-proj/FF biases

    def layer_norm(v, r_gamma, r_beta):
        mu = jnp.mean(v, axis=-1, keepdims=True)
        var = jnp.mean(jnp.square(v - mu), axis=-1, keepdims=True)
        return ((v - mu) * lax.rsqrt(var + eps) * small[r_gamma:r_gamma + 1, :D]
                + small[r_beta:r_beta + 1, :D])

    def attention(x_q, x_kv, idx, bias_row):
        # Head-batched projections: (nhead, S, D) x (nhead, Dh, D) -> (nhead, S, Dh).
        xq = jnp.broadcast_to(x_q.astype(jnp.bfloat16), (nhead, S, D))
        xkv = xq if x_kv is x_q else jnp.broadcast_to(
            x_kv.astype(jnp.bfloat16), (nhead, S, D))

        def proj(x_b, j):
            a = (idx * 3 + j) * nhead
            w = w_in_ref[0, a:a + nhead]               # (nhead, Dh, D) bf16
            b = b_in_ref[0, a:a + nhead]               # (nhead, 1, Dh) f32
            y = lax.dot_general(x_b, w, (((2,), (2,)), ((0,), (0,))),
                                preferred_element_type=jnp.float32)
            return y + b

        q3 = proj(xq, 0)
        k3 = proj(xkv, 1)
        v3 = proj(xkv, 2)

        s = lax.dot_general(q3.astype(jnp.bfloat16), k3.astype(jnp.bfloat16),
                            (((2,), (2,)), ((0,), (0,))),
                            preferred_element_type=jnp.float32) * scale
        s = jnp.where(causal, -1e30, s)
        s = s - jnp.max(s, axis=-1, keepdims=True)
        e = jnp.exp(s)
        p = e * pl.reciprocal(jnp.sum(e, axis=-1, keepdims=True), approx=True)

        o3 = lax.dot_general(p.astype(jnp.bfloat16), v3.astype(jnp.bfloat16),
                             (((2,), (1,)), ((0,), (0,))),
                             preferred_element_type=jnp.float32)   # (nhead, S, Dh)
        wo = w_out_ref[0, idx * nhead:(idx + 1) * nhead]           # (nhead, Dh, D) bf16
        partial = lax.dot_general(o3.astype(jnp.bfloat16), wo,
                                  (((2,), (1,)), ((0,), (0,))),
                                  preferred_element_type=jnp.float32)
        return jnp.sum(partial, axis=0) + small[bias_row:bias_row + 1, :D]

    x = x_res[...]
    mem = mem_res[...]

    # --- self-attention block (norm_first) ---
    xn = layer_norm(x, 0, 1)
    x = x + attention(xn, xn, 0, 6)

    # --- cross-attention block: memory = embedded src, memory_mask = causal mask ---
    xn = layer_norm(x, 2, 3)
    x = x + attention(xn, mem, 1, 7)

    # --- feed-forward block ---
    xn = layer_norm(x, 4, 5)
    h = jnp.dot(xn.astype(jnp.bfloat16), w_ff1_ref[0],
                preferred_element_type=jnp.float32) + small[8:9, :F]
    h = jnp.maximum(h, 0.0)
    x = x + jnp.dot(h.astype(jnp.bfloat16), w_ff2_ref[0],
                    preferred_element_type=jnp.float32) + small[9:10, :D]
    x_res[...] = x

    # ---- last layer step: fused output heads, lane-dense padded (S, 128) write ----
    @pl.when(l == num_layers - 1)
    def _heads():
        y = jnp.dot(x.astype(jnp.bfloat16), head_w_ref[...],
                    preferred_element_type=jnp.float32) + head_b_ref[...]
        c = lax.broadcasted_iota(jnp.int32, y.shape, 1)
        is_bin = (c >= cont_len) & (c < cont_len + bin_len)
        y = jnp.where(is_bin, jax.nn.sigmoid(y), y)
        out_ref[0] = y.astype(out_ref.dtype)


# ----------------------------------- wrapper ------------------------------------ #

def _const_spec(a):
    nd = a.ndim
    return pl.BlockSpec(a.shape, lambda b, l, _nd=nd: (0,) * _nd)


def _layer_spec(a):
    nd = a.ndim
    return pl.BlockSpec((1,) + a.shape[1:],
                        lambda b, l, _nd=nd: (l,) + (0,) * (_nd - 1))


def transformer_forward(params, src, *, nhead, cont_len, bin_len, oh_len):
    B, S, F_in = src.shape
    D = params["emb_w_t"].shape[1]
    L = params["w_ff1"].shape[0]
    HP = params["head_w_t"].shape[1]

    pe_rows = params["pe"][:B].reshape(B, 1, D)

    kernel = functools.partial(_fused_forward_kernel, nhead=nhead, eps=1e-5,
                               cont_len=cont_len, bin_len=bin_len)

    out = pl.pallas_call(
        kernel,
        grid=(B, L),
        in_specs=[
            pl.BlockSpec((1, S, F_in), lambda b, l: (b, 0, 0)),
            pl.BlockSpec((1, 1, D), lambda b, l: (b, 0, 0)),
            _const_spec(params["emb_w_t"]),
            _const_spec(params["emb_b"]),
            _layer_spec(params["w_in3"]),
            _layer_spec(params["b_in3"]),
            _layer_spec(params["w_out3"]),
            _layer_spec(params["w_ff1"]),
            _layer_spec(params["w_ff2"]),
            _layer_spec(params["p_small"]),
            _const_spec(params["head_w_t"]),
            _const_spec(params["head_b"]),
        ],
        out_specs=pl.BlockSpec((1, S, HP), lambda b, l: (b, 0, 0)),
        out_shape=jax.ShapeDtypeStruct((B, S, HP), jnp.float32),
        scratch_shapes=[pltpu.VMEM((S, D), jnp.float32),   # residual stream x
                        pltpu.VMEM((S, D), jnp.float32)],  # memory (embedded src)
        compiler_params=pltpu.CompilerParams(
            dimension_semantics=("parallel", "arbitrary")),
    )(src, pe_rows, params["emb_w_t"], params["emb_b"],
      params["w_in3"], params["b_in3"], params["w_out3"],
      params["w_ff1"], params["w_ff2"], params["p_small"],
      params["head_w_t"], params["head_b"])

    c_mean = out[..., :cont_len]
    b_out = out[..., cont_len:cont_len + bin_len]
    oh = out[..., cont_len + bin_len:cont_len + bin_len + oh_len]
    return c_mean, b_out, oh


# ----------------------------- parameter utilities ------------------------------ #

def positional_encoding_table(max_len, d_model):
    position = jnp.arange(max_len, dtype=jnp.float32)[:, None]
    div_term = jnp.exp(
        jnp.arange(0, d_model, 2, dtype=jnp.float32) * (-math.log(10000.0) / d_model))
    pe = jnp.zeros((max_len, d_model), jnp.float32)
    pe = pe.at[:, 0::2].set(jnp.sin(position * div_term))
    pe = pe.at[:, 1::2].set(jnp.cos(position * div_term))
    return pe


def init_params(key, num_features, d_model, nhead, num_layers, dim_ff,
                cont_len, bin_len, oh_len):
    """Random params in PyTorch layout: Linear weight = (out_features, in_features)."""
    n_dense = 4 + 6 * num_layers
    keys = iter(jax.random.split(key, 2 * n_dense + 2))

    def dense(n_out, n_in, scale=0.05):
        w = scale * jax.random.normal(next(keys), (n_out, n_in), jnp.float32)
        b = 0.01 * jax.random.normal(next(keys), (n_out,), jnp.float32)
        return w, b

    params = {}
    params["emb_w"], params["emb_b"] = dense(d_model, num_features)
    layers = []
    for _ in range(num_layers):
        lp = {}
        iw, ib = dense(3 * d_model, d_model)
        ow, ob = dense(d_model, d_model)
        lp["self_attn"] = {"in_w": iw, "in_b": ib, "out_w": ow, "out_b": ob}
        iw, ib = dense(3 * d_model, d_model)
        ow, ob = dense(d_model, d_model)
        lp["cross_attn"] = {"in_w": iw, "in_b": ib, "out_w": ow, "out_b": ob}
        lp["ff1_w"], lp["ff1_b"] = dense(dim_ff, d_model)
        lp["ff2_w"], lp["ff2_b"] = dense(d_model, dim_ff)
        for n in ("norm1", "norm2", "norm3"):
            lp[n + "_g"] = jnp.ones((d_model,), jnp.float32)
            lp[n + "_b"] = jnp.zeros((d_model,), jnp.float32)
        layers.append(lp)
    params["layers"] = layers
    params["mean_w"], params["mean_b"] = dense(cont_len, d_model)
    params["bin_w"], params["bin_b"] = dense(bin_len, d_model)
    params["oh_w"], params["oh_b"] = dense(oh_len, d_model)
    return params


def prepare_params(raw, nhead, max_len=5000):
    """Repack PyTorch-layout params into the stacked / packed slabs the kernel expects."""
    D = raw["emb_w"].shape[0]
    dim_ff = raw["layers"][0]["ff1_w"].shape[0]
    Dh = D // nhead
    slab_w = ((max(128, D, dim_ff) + 127) // 128) * 128

    def wT(w):
        return jnp.asarray(w, jnp.float32).T.astype(jnp.bfloat16)

    p = {"emb_w_t": wT(raw["emb_w"]),
         "emb_b": jnp.asarray(raw["emb_b"], jnp.float32).reshape(1, -1)}

    w_in_l, b_in_l, w_out_l, w_ff1_l, w_ff2_l, small_l = [], [], [], [], [], []
    for lr in raw["layers"]:
        w_in_parts, b_in_parts, w_out_parts = [], [], []
        for name in ("self_attn", "cross_attn"):
            a = lr[name]
            in_w = jnp.asarray(a["in_w"], jnp.float32)          # (3D, D)
            in_b = jnp.asarray(a["in_b"], jnp.float32)          # (3D,)
            w_in_parts.append(in_w.reshape(3 * nhead, Dh, D))   # per-head q/k/v rows
            b_in_parts.append(in_b.reshape(3 * nhead, 1, Dh))
            out_w = jnp.asarray(a["out_w"], jnp.float32)         # (D, D)
            w_out_parts.append(out_w.T.reshape(nhead, Dh, D))    # per-head out-proj
        w_in_l.append(jnp.concatenate(w_in_parts, axis=0).astype(jnp.bfloat16))
        b_in_l.append(jnp.concatenate(b_in_parts, axis=0))
        w_out_l.append(jnp.concatenate(w_out_parts, axis=0).astype(jnp.bfloat16))
        w_ff1_l.append(wT(lr["ff1_w"]))
        w_ff2_l.append(wT(lr["ff2_w"]))

        slab = jnp.zeros((16, slab_w), jnp.float32)

        def put(s, r, v):
            v = jnp.asarray(v, jnp.float32).reshape(-1)
            return s.at[r, :v.shape[0]].set(v)

        slab = put(slab, 0, lr["norm1_g"]); slab = put(slab, 1, lr["norm1_b"])
        slab = put(slab, 2, lr["norm2_g"]); slab = put(slab, 3, lr["norm2_b"])
        slab = put(slab, 4, lr["norm3_g"]); slab = put(slab, 5, lr["norm3_b"])
        slab = put(slab, 6, lr["self_attn"]["out_b"])
        slab = put(slab, 7, lr["cross_attn"]["out_b"])
        slab = put(slab, 8, lr["ff1_b"])
        slab = put(slab, 9, lr["ff2_b"])
        small_l.append(slab)

    p["w_in3"] = jnp.stack(w_in_l)      # (L, 6*nhead, Dh, D) bf16
    p["b_in3"] = jnp.stack(b_in_l)      # (L, 6*nhead, 1, Dh) f32
    p["w_out3"] = jnp.stack(w_out_l)    # (L, 2*nhead, Dh, D) bf16
    p["w_ff1"] = jnp.stack(w_ff1_l)     # (L, D, F) bf16
    p["w_ff2"] = jnp.stack(w_ff2_l)     # (L, F, D) bf16
    p["p_small"] = jnp.stack(small_l)   # (L, 16, 128) f32

    # Fused + lane-dense (128-padded) output heads: [continuous | binary | onehot | 0...].
    head_w = jnp.concatenate([raw["mean_w"], raw["bin_w"], raw["oh_w"]], axis=0)
    head_b = jnp.concatenate([raw["mean_b"], raw["bin_b"], raw["oh_b"]], axis=0)
    n_out = head_w.shape[0]
    assert n_out <= 128
    hw = jnp.zeros((D, 128), jnp.float32).at[:, :n_out].set(head_w.T)
    hb = jnp.zeros((1, 128), jnp.float32).at[:, :n_out].set(head_b.reshape(1, -1))
    p["head_w_t"] = hw.astype(jnp.bfloat16)
    p["head_b"] = hb
    p["pe"] = positional_encoding_table(max_len, D)
    return p


# ------------------------------------- main -------------------------------------- #

if __name__ == "__main__":
    # Small shapes consistent with the module:
    #   continuous_length=7 (6 time features + 1 log-amount), binary_length=1,
    #   onehot_length=4  =>  num_features = 12
    B, S = 2, 8
    cont_len, bin_len, oh_len = 7, 1, 4
    num_features = cont_len + bin_len + oh_len
    d_model, nhead, num_layers, dim_ff = 32, 4, 2, 64
    assert d_model % nhead == 0

    key = jax.random.PRNGKey(0)
    k_param, k_in = jax.random.split(key)
    raw = init_params(k_param, num_features, d_model, nhead, num_layers, dim_ff,
                      cont_len, bin_len, oh_len)
    params = prepare_params(raw, nhead=nhead, max_len=5000)

    src = jax.random.normal(k_in, (B, S, num_features), jnp.float32)

    fwd = jax.jit(functools.partial(transformer_forward, nhead=nhead,
                                    cont_len=cont_len, bin_len=bin_len, oh_len=oh_len))
    c_mean, b_out, oh = fwd(params, src)
    jax.block_until_ready((c_mean, b_out, oh))

    assert c_mean.shape == (B, S, cont_len)
    assert b_out.shape == (B, S, bin_len)
    assert oh.shape == (B, S, oh_len)
    assert bool(jnp.all(jnp.isfinite(c_mean)))
    assert bool(jnp.all((b_out >= 0.0) & (b_out <= 1.0)))
    print("KERNEL_OK")
</pallas_src>

<mosaic_0001>
module attributes {stable_mosaic.version = 11 : i64} {
  func.func @_fused_forward_kernel(%arg0: i32, %arg1: i32, %arg2: memref<1x8x12xf32, #tpu.memory_space<vmem>>, %arg3: memref<1x1x32xf32, #tpu.memory_space<vmem>>, %arg4: memref<12x32xbf16, #tpu.memory_space<vmem>>, %arg5: memref<1x32xf32, #tpu.memory_space<vmem>>, %arg6: memref<1x24x8x32xbf16, #tpu.memory_space<vmem>>, %arg7: memref<1x24x1x8xf32, #tpu.memory_space<vmem>>, %arg8: memref<1x8x8x32xbf16, #tpu.memory_space<vmem>>, %arg9: memref<1x32x64xbf16, #tpu.memory_space<vmem>>, %arg10: memref<1x64x32xbf16, #tpu.memory_space<vmem>>, %arg11: memref<1x16x128xf32, #tpu.memory_space<vmem>>, %arg12: memref<32x128xbf16, #tpu.memory_space<vmem>>, %arg13: memref<1x128xf32, #tpu.memory_space<vmem>>, %arg14: memref<1x8x128xf32, #tpu.memory_space<vmem>>, %arg15: memref<8x32xf32, #tpu.memory_space<vmem>>, %arg16: memref<8x32xf32, #tpu.memory_space<vmem>>) attributes {dimension_semantics = [#tpu.dimension_semantics<parallel>, #tpu.dimension_semantics<arbitrary>], iteration_bounds = array<i64: 2, 2>, scalar_prefetch = 0 : i64, scratch_operands = 2 : i64, tpu.core_type = #tpu.core_type<tc>, window_params = [{transform_indices = @transform_0, window_bounds = array<i64: 1, 8, 12>}, {transform_indices = @transform_1, window_bounds = array<i64: 1, 1, 32>}, {pipeline_mode = #tpu.pipeline_mode<synchronous>, transform_indices = @transform_2, window_bounds = array<i64: 12, 32>}, {pipeline_mode = #tpu.pipeline_mode<synchronous>, transform_indices = @transform_3, window_bounds = array<i64: 1, 32>}, {transform_indices = @transform_4, window_bounds = array<i64: 1, 24, 8, 32>}, {transform_indices = @transform_5, window_bounds = array<i64: 1, 24, 1, 8>}, {transform_indices = @transform_6, window_bounds = array<i64: 1, 8, 8, 32>}, {transform_indices = @transform_7, window_bounds = array<i64: 1, 32, 64>}, {transform_indices = @transform_8, window_bounds = array<i64: 1, 64, 32>}, {transform_indices = @transform_9, window_bounds = array<i64: 1, 16, 128>}, {pipeline_mode = #tpu.pipeline_mode<synchronous>, transform_indices = @transform_10, window_bounds = array<i64: 32, 128>}, {pipeline_mode = #tpu.pipeline_mode<synchronous>, transform_indices = @transform_11, window_bounds = array<i64: 1, 128>}, {transform_indices = @transform_12, window_bounds = array<i64: 1, 8, 128>}]} {
    %c0_i32 = arith.constant 0 : i32
    %0 = arith.cmpi eq, %arg1, %c0_i32 : i32
    %1 = arith.extui %0 : i1 to i32
    %c0_i32_0 = arith.constant 0 : i32
    %2 = arith.cmpi ne, %1, %c0_i32_0 : i32
    scf.if %2 {
      %c0_106 = arith.constant 0 : index
      %c0_107 = arith.constant 0 : index
      %c0_108 = arith.constant 0 : index
      %216 = vector.load %arg2[%c0_106, %c0_107, %c0_108] : memref<1x8x12xf32, #tpu.memory_space<vmem>>, vector<1x8x12xf32>
      %217 = vector.shape_cast %216 : vector<1x8x12xf32> to vector<8x12xf32>
      %218 = arith.truncf %217 : vector<8x12xf32> to vector<8x12xbf16>
      %c0_109 = arith.constant 0 : index
      %c0_110 = arith.constant 0 : index
      %219 = vector.load %arg4[%c0_109, %c0_110] : memref<12x32xbf16, #tpu.memory_space<vmem>>, vector<12x32xbf16>
      %cst_111 = arith.constant dense<0.000000e+00> : vector<8x32xf32>
      %220 = tpu.matmul %218, %219, %cst_111 {dimension_numbers = #tpu.dot_dimension_numbers<[1], [0], [0], [1], [0, 0, 1, 1], [], []>} : vector<8x12xbf16>, vector<12x32xbf16>, vector<8x32xf32> -> vector<8x32xf32>
      %c0_112 = arith.constant 0 : index
      %c0_113 = arith.constant 0 : index
      %221 = vector.load %arg5[%c0_112, %c0_113] : memref<1x32xf32, #tpu.memory_space<vmem>>, vector<1x32xf32>
      %222 = vector.broadcast %221 : vector<1x32xf32> to vector<8x32xf32>
      %223 = arith.addf %220, %222 : vector<8x32xf32>
      %c0_114 = arith.constant 0 : index
      %c0_115 = arith.constant 0 : index
      %c0_116 = arith.constant 0 : index
      %224 = vector.load %arg3[%c0_114, %c0_115, %c0_116] : memref<1x1x32xf32, #tpu.memory_space<vmem>>, vector<1x1x32xf32>
      %225 = vector.shape_cast %224 : vector<1x1x32xf32> to vector<1x32xf32>
      %226 = vector.broadcast %225 : vector<1x32xf32> to vector<8x32xf32>
      %227 = arith.addf %223, %226 : vector<8x32xf32>
      %c0_117 = arith.constant 0 : index
      %c0_118 = arith.constant 0 : index
      %228 = vector.load %arg15[%c0_117, %c0_118] : memref<8x32xf32, #tpu.memory_space<vmem>>, vector<8x32xf32>
      tpu.vector_store %arg15[%c0_117, %c0_118], %227 {strides = array<i32>} : memref<8x32xf32, #tpu.memory_space<vmem>>, vector<8x32xf32>,
      %c0_119 = arith.constant 0 : index
      %c0_120 = arith.constant 0 : index
      %229 = vector.load %arg16[%c0_119, %c0_120] : memref<8x32xf32, #tpu.memory_space<vmem>>, vector<8x32xf32>
      tpu.vector_store %arg16[%c0_119, %c0_120], %227 {strides = array<i32>} : memref<8x32xf32, #tpu.memory_space<vmem>>, vector<8x32xf32>,
    } else {
    }
    %3 = tpu.iota {dimensions = array<i32: 1>} : vector<1x8x8xi32>
    %4 = tpu.iota {dimensions = array<i32: 2>} : vector<1x8x8xi32>
    %5 = arith.cmpi sgt, %4, %3 : vector<1x8x8xi32>
    %c0 = arith.constant 0 : index
    %c0_1 = arith.constant 0 : index
    %c0_2 = arith.constant 0 : index
    %6 = vector.load %arg11[%c0, %c0_1, %c0_2] : memref<1x16x128xf32, #tpu.memory_space<vmem>>, vector<1x16x128xf32>
    %7 = vector.shape_cast %6 : vector<1x16x128xf32> to vector<16x128xf32>
    %c0_3 = arith.constant 0 : index
    %c0_4 = arith.constant 0 : index
    %8 = vector.load %arg15[%c0_3, %c0_4] : memref<8x32xf32, #tpu.memory_space<vmem>>, vector<8x32xf32>
    %c0_5 = arith.constant 0 : index
    %c0_6 = arith.constant 0 : index
    %9 = vector.load %arg16[%c0_5, %c0_6] : memref<8x32xf32, #tpu.memory_space<vmem>>, vector<8x32xf32>
    %cst = arith.constant dense<0.000000e+00> : vector<8xf32>
    %10 = vector.multi_reduction <add>, %8, %cst [1] : vector<8x32xf32> to vector<8xf32>
    %11 = vector.shape_cast %10 : vector<8xf32> to vector<8x1xf32>
    %cst_7 = arith.constant 3.200000e+01 : f32
    %12 = vector.broadcast %cst_7 : f32 to vector<8x1xf32>
    %13 = arith.divf %11, %12 : vector<8x1xf32>
    %14 = vector.broadcast %13 : vector<8x1xf32> to vector<8x32xf32>
    %15 = arith.subf %8, %14 : vector<8x32xf32>
    %16 = arith.mulf %15, %15 : vector<8x32xf32>
    %cst_8 = arith.constant dense<0.000000e+00> : vector<8xf32>
    %17 = vector.multi_reduction <add>, %16, %cst_8 [1] : vector<8x32xf32> to vector<8xf32>
    %18 = vector.shape_cast %17 : vector<8xf32> to vector<8x1xf32>
    %cst_9 = arith.constant 3.200000e+01 : f32
    %19 = vector.broadcast %cst_9 : f32 to vector<8x1xf32>
    %20 = arith.divf %18, %19 : vector<8x1xf32>
    %21 = vector.broadcast %13 : vector<8x1xf32> to vector<8x32xf32>
    %22 = arith.subf %8, %21 : vector<8x32xf32>
    %cst_10 = arith.constant 9.99999974E-6 : f32
    %23 = vector.broadcast %cst_10 : f32 to vector<8x1xf32>
    %24 = arith.addf %20, %23 : vector<8x1xf32>
    %25 = math.rsqrt %24 : vector<8x1xf32>
    %26 = vector.broadcast %25 : vector<8x1xf32> to vector<8x32xf32>
    %27 = arith.mulf %22, %26 : vector<8x32xf32>
    %28 = vector.extract_strided_slice %7 {offsets = [0, 0], sizes = [1, 32], strides = [1, 1]} : vector<16x128xf32> to vector<1x32xf32>
    %29 = vector.broadcast %28 : vector<1x32xf32> to vector<8x32xf32>
    %30 = arith.mulf %27, %29 : vector<8x32xf32>
    %31 = vector.extract_strided_slice %7 {offsets = [1, 0], sizes = [1, 32], strides = [1, 1]} : vector<16x128xf32> to vector<1x32xf32>
    %32 = vector.broadcast %31 : vector<1x32xf32> to vector<8x32xf32>
    %33 = arith.addf %30, %32 : vector<8x32xf32>
    %34 = arith.truncf %33 : vector<8x32xf32> to vector<8x32xbf16>
    %35 = vector.shape_cast %34 : vector<8x32xbf16> to vector<1x8x32xbf16>
    %36 = vector.broadcast %35 : vector<1x8x32xbf16> to vector<4x8x32xbf16>
    %c0_11 = arith.constant 0 : index
    %c0_12 = arith.constant 0 : index
    %c0_13 = arith.constant 0 : index
    %c0_14 = arith.constant 0 : index
    %37 = vector.load %arg6[%c0_11, %c0_12, %c0_13, %c0_14] : memref<1x24x8x32xbf16, #tpu.memory_space<vmem>>, vector<1x4x8x32xbf16>
    %38 = vector.shape_cast %37 : vector<1x4x8x32xbf16> to vector<4x8x32xbf16>
    %c0_15 = arith.constant 0 : index
    %c0_16 = arith.constant 0 : index
    %c0_17 = arith.constant 0 : index
    %c0_18 = arith.constant 0 : index
    %39 = vector.load %arg7[%c0_15, %c0_16, %c0_17, %c0_18] : memref<1x24x1x8xf32, #tpu.memory_space<vmem>>, vector<1x4x1x8xf32>
    %40 = vector.shape_cast %39 : vector<1x4x1x8xf32> to vector<4x1x8xf32>
    %cst_19 = arith.constant dense<0.000000e+00> : vector<4x8x8xf32>
    %41 = tpu.matmul %36, %38, %cst_19 {dimension_numbers = #tpu.dot_dimension_numbers<[2], [2], [1], [1], [0, 0, 0, 1, 1, 1], [0], [0]>} : vector<4x8x32xbf16>, vector<4x8x32xbf16>, vector<4x8x8xf32> -> vector<4x8x8xf32>
    %42 = vector.broadcast %40 : vector<4x1x8xf32> to vector<4x8x8xf32>
    %43 = arith.addf %41, %42 : vector<4x8x8xf32>
    %c0_20 = arith.constant 0 : index
    %c4 = arith.constant 4 : index
    %c0_21 = arith.constant 0 : index
    %c0_22 = arith.constant 0 : index
    %44 = vector.load %arg6[%c0_20, %c4, %c0_21, %c0_22] : memref<1x24x8x32xbf16, #tpu.memory_space<vmem>>, vector<1x4x8x32xbf16>
    %45 = vector.shape_cast %44 : vector<1x4x8x32xbf16> to vector<4x8x32xbf16>
    %c0_23 = arith.constant 0 : index
    %c4_24 = arith.constant 4 : index
    %c0_25 = arith.constant 0 : index
    %c0_26 = arith.constant 0 : index
    %46 = vector.load %arg7[%c0_23, %c4_24, %c0_25, %c0_26] : memref<1x24x1x8xf32, #tpu.memory_space<vmem>>, vector<1x4x1x8xf32>
    %47 = vector.shape_cast %46 : vector<1x4x1x8xf32> to vector<4x1x8xf32>
    %cst_27 = arith.constant dense<0.000000e+00> : vector<4x8x8xf32>
    %48 = tpu.matmul %36, %45, %cst_27 {dimension_numbers = #tpu.dot_dimension_numbers<[2], [2], [1], [1], [0, 0, 0, 1, 1, 1], [0], [0]>} : vector<4x8x32xbf16>, vector<4x8x32xbf16>, vector<4x8x8xf32> -> vector<4x8x8xf32>
    %49 = vector.broadcast %47 : vector<4x1x8xf32> to vector<4x8x8xf32>
    %50 = arith.addf %48, %49 : vector<4x8x8xf32>
    %c0_28 = arith.constant 0 : index
    %c8 = arith.constant 8 : index
    %c0_29 = arith.constant 0 : index
    %c0_30 = arith.constant 0 : index
    %51 = vector.load %arg6[%c0_28, %c8, %c0_29, %c0_30] : memref<1x24x8x32xbf16, #tpu.memory_space<vmem>>, vector<1x4x8x32xbf16>
    %52 = vector.shape_cast %51 : vector<1x4x8x32xbf16> to vector<4x8x32xbf16>
    %c0_31 = arith.constant 0 : index
    %c8_32 = arith.constant 8 : index
    %c0_33 = arith.constant 0 : index
    %c0_34 = arith.constant 0 : index
    %53 = vector.load %arg7[%c0_31, %c8_32, %c0_33, %c0_34] : memref<1x24x1x8xf32, #tpu.memory_space<vmem>>, vector<1x4x1x8xf32>
    %54 = vector.shape_cast %53 : vector<1x4x1x8xf32> to vector<4x1x8xf32>
    %cst_35 = arith.constant dense<0.000000e+00> : vector<4x8x8xf32>
    %55 = tpu.matmul %36, %52, %cst_35 {dimension_numbers = #tpu.dot_dimension_numbers<[2], [2], [1], [1], [0, 0, 0, 1, 1, 1], [0], [0]>} : vector<4x8x32xbf16>, vector<4x8x32xbf16>, vector<4x8x8xf32> -> vector<4x8x8xf32>
    %56 = vector.broadcast %54 : vector<4x1x8xf32> to vector<4x8x8xf32>
    %57 = arith.addf %55, %56 : vector<4x8x8xf32>
    %58 = arith.truncf %43 : vector<4x8x8xf32> to vector<4x8x8xbf16>
    %59 = arith.truncf %50 : vector<4x8x8xf32> to vector<4x8x8xbf16>
    %cst_36 = arith.constant dense<0.000000e+00> : vector<4x8x8xf32>
    %60 = tpu.matmul %58, %59, %cst_36 {dimension_numbers = #tpu.dot_dimension_numbers<[2], [2], [1], [1], [0, 0, 0, 1, 1, 1], [0], [0]>} : vector<4x8x8xbf16>, vector<4x8x8xbf16>, vector<4x8x8xf32> -> vector<4x8x8xf32>
    %cst_37 = arith.constant 0.353553385 : f32
    %61 = vector.broadcast %cst_37 : f32 to vector<4x8x8xf32>
    %62 = arith.mulf %60, %61 : vector<4x8x8xf32>
    %cst_38 = arith.constant -1.000000e+30 : f32
    %63 = vector.shape_cast %5 : vector<1x8x8xi1> to vector<1x8x8xi1>
    %64 = vector.broadcast %63 : vector<1x8x8xi1> to vector<4x8x8xi1>
    %65 = vector.broadcast %cst_38 : f32 to vector<4x8x8xf32>
    %66 = arith.select %64, %65, %62 : vector<4x8x8xi1>, vector<4x8x8xf32>
    %cst_39 = arith.constant dense<0xFF800000> : vector<4x8xf32>
    %67 = vector.multi_reduction <maximumf>, %66, %cst_39 [2] : vector<4x8x8xf32> to vector<4x8xf32>
    %68 = vector.shape_cast %67 : vector<4x8xf32> to vector<4x8x1xf32>
    %69 = vector.broadcast %68 : vector<4x8x1xf32> to vector<4x8x8xf32>
    %70 = arith.subf %66, %69 : vector<4x8x8xf32>
    %71 = math.exp %70 : vector<4x8x8xf32>
    %cst_40 = arith.constant dense<0.000000e+00> : vector<4x8xf32>
    %72 = vector.multi_reduction <add>, %71, %cst_40 [2] : vector<4x8x8xf32> to vector<4x8xf32>
    %73 = vector.shape_cast %72 : vector<4x8xf32> to vector<4x8x1xf32>
    %74 = tpu.reciprocal %73 {approx = true} : vector<4x8x1xf32> -> vector<4x8x1xf32>
    %75 = vector.broadcast %74 : vector<4x8x1xf32> to vector<4x8x8xf32>
    %76 = arith.mulf %71, %75 : vector<4x8x8xf32>
    %77 = arith.truncf %76 : vector<4x8x8xf32> to vector<4x8x8xbf16>
    %78 = arith.truncf %57 : vector<4x8x8xf32> to vector<4x8x8xbf16>
    %cst_41 = arith.constant dense<0.000000e+00> : vector<4x8x8xf32>
    %79 = tpu.matmul %77, %78, %cst_41 {dimension_numbers = #tpu.dot_dimension_numbers<[2], [1], [1], [2], [0, 0, 0, 1, 1, 2], [0], [0]>} : vector<4x8x8xbf16>, vector<4x8x8xbf16>, vector<4x8x8xf32> -> vector<4x8x8xf32>
    %c0_42 = arith.constant 0 : index
    %c0_43 = arith.constant 0 : index
    %c0_44 = arith.constant 0 : index
    %c0_45 = arith.constant 0 : index
    %80 = vector.load %arg8[%c0_42, %c0_43, %c0_44, %c0_45] : memref<1x8x8x32xbf16, #tpu.memory_space<vmem>>, vector<1x4x8x32xbf16>
    %81 = vector.shape_cast %80 : vector<1x4x8x32xbf16> to vector<4x8x32xbf16>
    %82 = arith.truncf %79 : vector<4x8x8xf32> to vector<4x8x8xbf16>
    %cst_46 = arith.constant dense<0.000000e+00> : vector<4x8x32xf32>
    %83 = tpu.matmul %82, %81, %cst_46 {dimension_numbers = #tpu.dot_dimension_numbers<[2], [1], [1], [2], [0, 0, 0, 1, 1, 2], [0], [0]>} : vector<4x8x8xbf16>, vector<4x8x32xbf16>, vector<4x8x32xf32> -> vector<4x8x32xf32>
    %cst_47 = arith.constant dense<0.000000e+00> : vector<8x32xf32>
    %84 = vector.multi_reduction <add>, %83, %cst_47 [0] : vector<4x8x32xf32> to vector<8x32xf32>
    %85 = vector.extract_strided_slice %7 {offsets = [6, 0], sizes = [1, 32], strides = [1, 1]} : vector<16x128xf32> to vector<1x32xf32>
    %86 = vector.broadcast %85 : vector<1x32xf32> to vector<8x32xf32>
    %87 = arith.addf %84, %86 : vector<8x32xf32>
    %88 = arith.addf %8, %87 : vector<8x32xf32>
    %cst_48 = arith.constant dense<0.000000e+00> : vector<8xf32>
    %89 = vector.multi_reduction <add>, %88, %cst_48 [1] : vector<8x32xf32> to vector<8xf32>
    %90 = vector.shape_cast %89 : vector<8xf32> to vector<8x1xf32>
    %cst_49 = arith.constant 3.200000e+01 : f32
    %91 = vector.broadcast %cst_49 : f32 to vector<8x1xf32>
    %92 = arith.divf %90, %91 : vector<8x1xf32>
    %93 = vector.broadcast %92 : vector<8x1xf32> to vector<8x32xf32>
    %94 = arith.subf %88, %93 : vector<8x32xf32>
    %95 = arith.mulf %94, %94 : vector<8x32xf32>
    %cst_50 = arith.constant dense<0.000000e+00> : vector<8xf32>
    %96 = vector.multi_reduction <add>, %95, %cst_50 [1] : vector<8x32xf32> to vector<8xf32>
    %97 = vector.shape_cast %96 : vector<8xf32> to vector<8x1xf32>
    %cst_51 = arith.constant 3.200000e+01 : f32
    %98 = vector.broadcast %cst_51 : f32 to vector<8x1xf32>
    %99 = arith.divf %97, %98 : vector<8x1xf32>
    %100 = vector.broadcast %92 : vector<8x1xf32> to vector<8x32xf32>
    %101 = arith.subf %88, %100 : vector<8x32xf32>
    %cst_52 = arith.constant 9.99999974E-6 : f32
    %102 = vector.broadcast %cst_52 : f32 to vector<8x1xf32>
    %103 = arith.addf %99, %102 : vector<8x1xf32>
    %104 = math.rsqrt %103 : vector<8x1xf32>
    %105 = vector.broadcast %104 : vector<8x1xf32> to vector<8x32xf32>
    %106 = arith.mulf %101, %105 : vector<8x32xf32>
    %107 = vector.extract_strided_slice %7 {offsets = [2, 0], sizes = [1, 32], strides = [1, 1]} : vector<16x128xf32> to vector<1x32xf32>
    %108 = vector.broadcast %107 : vector<1x32xf32> to vector<8x32xf32>
    %109 = arith.mulf %106, %108 : vector<8x32xf32>
    %110 = vector.extract_strided_slice %7 {offsets = [3, 0], sizes = [1, 32], strides = [1, 1]} : vector<16x128xf32> to vector<1x32xf32>
    %111 = vector.broadcast %110 : vector<1x32xf32> to vector<8x32xf32>
    %112 = arith.addf %109, %111 : vector<8x32xf32>
    %113 = arith.truncf %112 : vector<8x32xf32> to vector<8x32xbf16>
    %114 = vector.shape_cast %113 : vector<8x32xbf16> to vector<1x8x32xbf16>
    %115 = vector.broadcast %114 : vector<1x8x32xbf16> to vector<4x8x32xbf16>
    %116 = arith.truncf %9 : vector<8x32xf32> to vector<8x32xbf16>
    %117 = vector.shape_cast %116 : vector<8x32xbf16> to vector<1x8x32xbf16>
    %118 = vector.broadcast %117 : vector<1x8x32xbf16> to vector<4x8x32xbf16>
    %c0_53 = arith.constant 0 : index
    %c12 = arith.constant 12 : index
    %c0_54 = arith.constant 0 : index
    %c0_55 = arith.constant 0 : index
    %119 = vector.load %arg6[%c0_53, %c12, %c0_54, %c0_55] : memref<1x24x8x32xbf16, #tpu.memory_space<vmem>>, vector<1x4x8x32xbf16>
    %120 = vector.shape_cast %119 : vector<1x4x8x32xbf16> to vector<4x8x32xbf16>
    %c0_56 = arith.constant 0 : index
    %c12_57 = arith.constant 12 : index
    %c0_58 = arith.constant 0 : index
    %c0_59 = arith.constant 0 : index
    %121 = vector.load %arg7[%c0_56, %c12_57, %c0_58, %c0_59] : memref<1x24x1x8xf32, #tpu.memory_space<vmem>>, vector<1x4x1x8xf32>
    %122 = vector.shape_cast %121 : vector<1x4x1x8xf32> to vector<4x1x8xf32>
    %cst_60 = arith.constant dense<0.000000e+00> : vector<4x8x8xf32>
    %123 = tpu.matmul %115, %120, %cst_60 {dimension_numbers = #tpu.dot_dimension_numbers<[2], [2], [1], [1], [0, 0, 0, 1, 1, 1], [0], [0]>} : vector<4x8x32xbf16>, vector<4x8x32xbf16>, vector<4x8x8xf32> -> vector<4x8x8xf32>
    %124 = vector.broadcast %122 : vector<4x1x8xf32> to vector<4x8x8xf32>
    %125 = arith.addf %123, %124 : vector<4x8x8xf32>
    %c0_61 = arith.constant 0 : index
    %c16 = arith.constant 16 : index
    %c0_62 = arith.constant 0 : index
    %c0_63 = arith.constant 0 : index
    %126 = vector.load %arg6[%c0_61, %c16, %c0_62, %c0_63] : memref<1x24x8x32xbf16, #tpu.memory_space<vmem>>, vector<1x4x8x32xbf16>
    %127 = vector.shape_cast %126 : vector<1x4x8x32xbf16> to vector<4x8x32xbf16>
    %c0_64 = arith.constant 0 : index
    %c16_65 = arith.constant 16 : index
    %c0_66 = arith.constant 0 : index
    %c0_67 = arith.constant 0 : index
    %128 = vector.load %arg7[%c0_64, %c16_65, %c0_66, %c0_67] : memref<1x24x1x8xf32, #tpu.memory_space<vmem>>, vector<1x4x1x8xf32>
    %129 = vector.shape_cast %128 : vector<1x4x1x8xf32> to vector<4x1x8xf32>
    %cst_68 = arith.constant dense<0.000000e+00> : vector<4x8x8xf32>
    %130 = tpu.matmul %118, %127, %cst_68 {dimension_numbers = #tpu.dot_dimension_numbers<[2], [2], [1], [1], [0, 0, 0, 1, 1, 1], [0], [0]>} : vector<4x8x32xbf16>, vector<4x8x32xbf16>, vector<4x8x8xf32> -> vector<4x8x8xf32>
    %131 = vector.broadcast %129 : vector<4x1x8xf32> to vector<4x8x8xf32>
    %132 = arith.addf %130, %131 : vector<4x8x8xf32>
    %c0_69 = arith.constant 0 : index
    %c20 = arith.constant 20 : index
    %c0_70 = arith.constant 0 : index
    %c0_71 = arith.constant 0 : index
    %133 = vector.load %arg6[%c0_69, %c20, %c0_70, %c0_71] : memref<1x24x8x32xbf16, #tpu.memory_space<vmem>>, vector<1x4x8x32xbf16>
    %134 = vector.shape_cast %133 : vector<1x4x8x32xbf16> to vector<4x8x32xbf16>
    %c0_72 = arith.constant 0 : index
    %c20_73 = arith.constant 20 : index
    %c0_74 = arith.constant 0 : index
    %c0_75 = arith.constant 0 : index
    %135 = vector.load %arg7[%c0_72, %c20_73, %c0_74, %c0_75] : memref<1x24x1x8xf32, #tpu.memory_space<vmem>>, vector<1x4x1x8xf32>
    %136 = vector.shape_cast %135 : vector<1x4x1x8xf32> to vector<4x1x8xf32>
    %cst_76 = arith.constant dense<0.000000e+00> : vector<4x8x8xf32>
    %137 = tpu.matmul %118, %134, %cst_76 {dimension_numbers = #tpu.dot_dimension_numbers<[2], [2], [1], [1], [0, 0, 0, 1, 1, 1], [0], [0]>} : vector<4x8x32xbf16>, vector<4x8x32xbf16>, vector<4x8x8xf32> -> vector<4x8x8xf32>
    %138 = vector.broadcast %136 : vector<4x1x8xf32> to vector<4x8x8xf32>
    %139 = arith.addf %137, %138 : vector<4x8x8xf32>
    %140 = arith.truncf %125 : vector<4x8x8xf32> to vector<4x8x8xbf16>
    %141 = arith.truncf %132 : vector<4x8x8xf32> to vector<4x8x8xbf16>
    %cst_77 = arith.constant dense<0.000000e+00> : vector<4x8x8xf32>
    %142 = tpu.matmul %140, %141, %cst_77 {dimension_numbers = #tpu.dot_dimension_numbers<[2], [2], [1], [1], [0, 0, 0, 1, 1, 1], [0], [0]>} : vector<4x8x8xbf16>, vector<4x8x8xbf16>, vector<4x8x8xf32> -> vector<4x8x8xf32>
    %cst_78 = arith.constant 0.353553385 : f32
    %143 = vector.broadcast %cst_78 : f32 to vector<4x8x8xf32>
    %144 = arith.mulf %142, %143 : vector<4x8x8xf32>
    %cst_79 = arith.constant -1.000000e+30 : f32
    %145 = vector.shape_cast %5 : vector<1x8x8xi1> to vector<1x8x8xi1>
    %146 = vector.broadcast %145 : vector<1x8x8xi1> to vector<4x8x8xi1>
    %147 = vector.broadcast %cst_79 : f32 to vector<4x8x8xf32>
    %148 = arith.select %146, %147, %144 : vector<4x8x8xi1>, vector<4x8x8xf32>
    %cst_80 = arith.constant dense<0xFF800000> : vector<4x8xf32>
    %149 = vector.multi_reduction <maximumf>, %148, %cst_80 [2] : vector<4x8x8xf32> to vector<4x8xf32>
    %150 = vector.shape_cast %149 : vector<4x8xf32> to vector<4x8x1xf32>
    %151 = vector.broadcast %150 : vector<4x8x1xf32> to vector<4x8x8xf32>
    %152 = arith.subf %148, %151 : vector<4x8x8xf32>
    %153 = math.exp %152 : vector<4x8x8xf32>
    %cst_81 = arith.constant dense<0.000000e+00> : vector<4x8xf32>
    %154 = vector.multi_reduction <add>, %153, %cst_81 [2] : vector<4x8x8xf32> to vector<4x8xf32>
    %155 = vector.shape_cast %154 : vector<4x8xf32> to vector<4x8x1xf32>
    %156 = tpu.reciprocal %155 {approx = true} : vector<4x8x1xf32> -> vector<4x8x1xf32>
    %157 = vector.broadcast %156 : vector<4x8x1xf32> to vector<4x8x8xf32>
    %158 = arith.mulf %153, %157 : vector<4x8x8xf32>
    %159 = arith.truncf %158 : vector<4x8x8xf32> to vector<4x8x8xbf16>
    %160 = arith.truncf %139 : vector<4x8x8xf32> to vector<4x8x8xbf16>
    %cst_82 = arith.constant dense<0.000000e+00> : vector<4x8x8xf32>
    %161 = tpu.matmul %159, %160, %cst_82 {dimension_numbers = #tpu.dot_dimension_numbers<[2], [1], [1], [2], [0, 0, 0, 1, 1, 2], [0], [0]>} : vector<4x8x8xbf16>, vector<4x8x8xbf16>, vector<4x8x8xf32> -> vector<4x8x8xf32>
    %c0_83 = arith.constant 0 : index
    %c4_84 = arith.constant 4 : index
    %c0_85 = arith.constant 0 : index
    %c0_86 = arith.constant 0 : index
    %162 = vector.load %arg8[%c0_83, %c4_84, %c0_85, %c0_86] : memref<1x8x8x32xbf16, #tpu.memory_space<vmem>>, vector<1x4x8x32xbf16>
    %163 = vector.shape_cast %162 : vector<1x4x8x32xbf16> to vector<4x8x32xbf16>
    %164 = arith.truncf %161 : vector<4x8x8xf32> to vector<4x8x8xbf16>
    %cst_87 = arith.constant dense<0.000000e+00> : vector<4x8x32xf32>
    %165 = tpu.matmul %164, %163, %cst_87 {dimension_numbers = #tpu.dot_dimension_numbers<[2], [1], [1], [2], [0, 0, 0, 1, 1, 2], [0], [0]>} : vector<4x8x8xbf16>, vector<4x8x32xbf16>, vector<4x8x32xf32> -> vector<4x8x32xf32>
    %cst_88 = arith.constant dense<0.000000e+00> : vector<8x32xf32>
    %166 = vector.multi_reduction <add>, %165, %cst_88 [0] : vector<4x8x32xf32> to vector<8x32xf32>
    %167 = vector.extract_strided_slice %7 {offsets = [7, 0], sizes = [1, 32], strides = [1, 1]} : vector<16x128xf32> to vector<1x32xf32>
    %168 = vector.broadcast %167 : vector<1x32xf32> to vector<8x32xf32>
    %169 = arith.addf %166, %168 : vector<8x32xf32>
    %170 = arith.addf %88, %169 : vector<8x32xf32>
    %cst_89 = arith.constant dense<0.000000e+00> : vector<8xf32>
    %171 = vector.multi_reduction <add>, %170, %cst_89 [1] : vector<8x32xf32> to vector<8xf32>
    %172 = vector.shape_cast %171 : vector<8xf32> to vector<8x1xf32>
    %cst_90 = arith.constant 3.200000e+01 : f32
    %173 = vector.broadcast %cst_90 : f32 to vector<8x1xf32>
    %174 = arith.divf %172, %173 : vector<8x1xf32>
    %175 = vector.broadcast %174 : vector<8x1xf32> to vector<8x32xf32>
    %176 = arith.subf %170, %175 : vector<8x32xf32>
    %177 = arith.mulf %176, %176 : vector<8x32xf32>
    %cst_91 = arith.constant dense<0.000000e+00> : vector<8xf32>
    %178 = vector.multi_reduction <add>, %177, %cst_91 [1] : vector<8x32xf32> to vector<8xf32>
    %179 = vector.shape_cast %178 : vector<8xf32> to vector<8x1xf32>
    %cst_92 = arith.constant 3.200000e+01 : f32
    %180 = vector.broadcast %cst_92 : f32 to vector<8x1xf32>
    %181 = arith.divf %179, %180 : vector<8x1xf32>
    %182 = vector.broadcast %174 : vector<8x1xf32> to vector<8x32xf32>
    %183 = arith.subf %170, %182 : vector<8x32xf32>
    %cst_93 = arith.constant 9.99999974E-6 : f32
    %184 = vector.broadcast %cst_93 : f32 to vector<8x1xf32>
    %185 = arith.addf %181, %184 : vector<8x1xf32>
    %186 = math.rsqrt %185 : vector<8x1xf32>
    %187 = vector.broadcast %186 : vector<8x1xf32> to vector<8x32xf32>
    %188 = arith.mulf %183, %187 : vector<8x32xf32>
    %189 = vector.extract_strided_slice %7 {offsets = [4, 0], sizes = [1, 32], strides = [1, 1]} : vector<16x128xf32> to vector<1x32xf32>
    %190 = vector.broadcast %189 : vector<1x32xf32> to vector<8x32xf32>
    %191 = arith.mulf %188, %190 : vector<8x32xf32>
    %192 = vector.extract_strided_slice %7 {offsets = [5, 0], sizes = [1, 32], strides = [1, 1]} : vector<16x128xf32> to vector<1x32xf32>
    %193 = vector.broadcast %192 : vector<1x32xf32> to vector<8x32xf32>
    %194 = arith.addf %191, %193 : vector<8x32xf32>
    %195 = arith.truncf %194 : vector<8x32xf32> to vector<8x32xbf16>
    %c0_94 = arith.constant 0 : index
    %c0_95 = arith.constant 0 : index
    %c0_96 = arith.constant 0 : index
    %196 = vector.load %arg9[%c0_94, %c0_95, %c0_96] : memref<1x32x64xbf16, #tpu.memory_space<vmem>>, vector<1x32x64xbf16>
    %197 = vector.shape_cast %196 : vector<1x32x64xbf16> to vector<32x64xbf16>
    %cst_97 = arith.constant dense<0.000000e+00> : vector<8x64xf32>
    %198 = tpu.matmul %195, %197, %cst_97 {dimension_numbers = #tpu.dot_dimension_numbers<[1], [0], [0], [1], [0, 0, 1, 1], [], []>} : vector<8x32xbf16>, vector<32x64xbf16>, vector<8x64xf32> -> vector<8x64xf32>
    %199 = vector.extract_strided_slice %7 {offsets = [8, 0], sizes = [1, 64], strides = [1, 1]} : vector<16x128xf32> to vector<1x64xf32>
    %200 = vector.broadcast %199 : vector<1x64xf32> to vector<8x64xf32>
    %201 = arith.addf %198, %200 : vector<8x64xf32>
    %cst_98 = arith.constant 0.000000e+00 : f32
    %202 = vector.broadcast %cst_98 : f32 to vector<8x64xf32>
    %203 = arith.maximumf %201, %202 : vector<8x64xf32>
    %204 = arith.truncf %203 : vector<8x64xf32> to vector<8x64xbf16>
    %c0_99 = arith.constant 0 : index
    %c0_100 = arith.constant 0 : index
    %c0_101 = arith.constant 0 : index
    %205 = vector.load %arg10[%c0_99, %c0_100, %c0_101] : memref<1x64x32xbf16, #tpu.memory_space<vmem>>, vector<1x64x32xbf16>
    %206 = vector.shape_cast %205 : vector<1x64x32xbf16> to vector<64x32xbf16>
    %cst_102 = arith.constant dense<0.000000e+00> : vector<8x32xf32>
    %207 = tpu.matmul %204, %206, %cst_102 {dimension_numbers = #tpu.dot_dimension_numbers<[1], [0], [0], [1], [0, 0, 1, 1], [], []>} : vector<8x64xbf16>, vector<64x32xbf16>, vector<8x32xf32> -> vector<8x32xf32>
    %208 = arith.addf %170, %207 : vector<8x32xf32>
    %209 = vector.extract_strided_slice %7 {offsets = [9, 0], sizes = [1, 32], strides = [1, 1]} : vector<16x128xf32> to vector<1x32xf32>
    %210 = vector.broadcast %209 : vector<1x32xf32> to vector<8x32xf32>
    %211 = arith.addf %208, %210 : vector<8x32xf32>
    %c0_103 = arith.constant 0 : index
    %c0_104 = arith.constant 0 : index
    %212 = vector.load %arg15[%c0_103, %c0_104] : memref<8x32xf32, #tpu.memory_space<vmem>>, vector<8x32xf32>
    tpu.vector_store %arg15[%c0_103, %c0_104], %211 {strides = array<i32>} : memref<8x32xf32, #tpu.memory_space<vmem>>, vector<8x32xf32>,
    %c1_i32 = arith.constant 1 : i32
    %213 = arith.cmpi eq, %arg1, %c1_i32 : i32
    %214 = arith.extui %213 : i1 to i32
    %c0_i32_105 = arith.constant 0 : i32
    %215 = arith.cmpi ne, %214, %c0_i32_105 : i32
    scf.if %215 {
      %216 = arith.truncf %211 : vector<8x32xf32> to vector<8x32xbf16>
      %c0_106 = arith.constant 0 : index
      %c0_107 = arith.constant 0 : index
      %217 = vector.load %arg12[%c0_106, %c0_107] : memref<32x128xbf16, #tpu.memory_space<vmem>>, vector<32x128xbf16>
      %cst_108 = arith.constant dense<0.000000e+00> : vector<8x128xf32>
      %218 = tpu.matmul %216, %217, %cst_108 {dimension_numbers = #tpu.dot_dimension_numbers<[1], [0], [0], [1], [0, 0, 1, 1], [], []>} : vector<8x32xbf16>, vector<32x128xbf16>, vector<8x128xf32> -> vector<8x128xf32>
      %c0_109 = arith.constant 0 : index
      %c0_110 = arith.constant 0 : index
      %219 = vector.load %arg13[%c0_109, %c0_110] : memref<1x128xf32, #tpu.memory_space<vmem>>, vector<1x128xf32>
      %220 = vector.broadcast %219 : vector<1x128xf32> to vector<8x128xf32>
      %221 = arith.addf %218, %220 : vector<8x128xf32>
      %222 = tpu.iota {dimensions = array<i32: 1>} : vector<8x128xi32>
      %c7_i32 = arith.constant 7 : i32
      %223 = vector.broadcast %c7_i32 : i32 to vector<8x128xi32>
      %224 = arith.cmpi sge, %222, %223 : vector<8x128xi32>
      %c8_i32 = arith.constant 8 : i32
      %225 = vector.broadcast %c8_i32 : i32 to vector<8x128xi32>
      %226 = arith.cmpi slt, %222, %225 : vector<8x128xi32>
      %227 = arith.andi %224, %226 : vector<8x128xi1>
      %228 = arith.negf %221 : vector<8x128xf32>
      %229 = math.exp %228 : vector<8x128xf32>
      %cst_111 = arith.constant 1.000000e+00 : f32
      %230 = vector.broadcast %cst_111 : f32 to vector<8x128xf32>
      %231 = arith.addf %230, %229 : vector<8x128xf32>
      %232 = arith.divf %230, %231 : vector<8x128xf32>
      %233 = arith.select %227, %232, %221 : vector<8x128xi1>, vector<8x128xf32>
      %c0_112 = arith.constant 0 : index
      %c0_113 = arith.constant 0 : index
      %c0_114 = arith.constant 0 : index
      %234 = vector.load %arg14[%c0_112, %c0_113, %c0_114] : memref<1x8x128xf32, #tpu.memory_space<vmem>>, vector<1x8x128xf32>
      %235 = vector.shape_cast %234 : vector<1x8x128xf32> to vector<8x128xf32>
      %236 = vector.shape_cast %233 : vector<8x128xf32> to vector<1x8x128xf32>
      tpu.vector_store %arg14[%c0_112, %c0_113, %c0_114], %236 {strides = array<i32>} : memref<1x8x128xf32, #tpu.memory_space<vmem>>, vector<1x8x128xf32>,
    } else {
    }
    return
  }
  func.func @transform_0(%arg0: i32, %arg1: i32) -> (i32, i32, i32) {
    %c0_i32 = arith.constant 0 : i32
    %c0_i32_0 = arith.constant 0 : i32
    %c0_i32_1 = arith.constant 0 : i32
    return %arg0, %c0_i32, %c0_i32_0 : i32, i32, i32
  }
  func.func @transform_1(%arg0: i32, %arg1: i32) -> (i32, i32, i32) {
    %c0_i32 = arith.constant 0 : i32
    %c0_i32_0 = arith.constant 0 : i32
    %c0_i32_1 = arith.constant 0 : i32
    return %arg0, %c0_i32, %c0_i32_0 : i32, i32, i32
  }
  func.func @transform_2(%arg0: i32, %arg1: i32) -> (i32, i32) {
    %c0_i32 = arith.constant 0 : i32
    %c0_i32_0 = arith.constant 0 : i32
    %c0_i32_1 = arith.constant 0 : i32
    return %c0_i32, %c0_i32_0 : i32, i32
  }
  func.func @transform_3(%arg0: i32, %arg1: i32) -> (i32, i32) {
    %c0_i32 = arith.constant 0 : i32
    %c0_i32_0 = arith.constant 0 : i32
    %c0_i32_1 = arith.constant 0 : i32
    return %c0_i32, %c0_i32_0 : i32, i32
  }
  func.func @transform_4(%arg0: i32, %arg1: i32) -> (i32, i32, i32, i32) {
    %c0_i32 = arith.constant 0 : i32
    %c0_i32_0 = arith.constant 0 : i32
    %c0_i32_1 = arith.constant 0 : i32
    %c0_i32_2 = arith.constant 0 : i32
    return %arg1, %c0_i32, %c0_i32_0, %c0_i32_1 : i32, i32, i32, i32
  }
  func.func @transform_5(%arg0: i32, %arg1: i32) -> (i32, i32, i32, i32) {
    %c0_i32 = arith.constant 0 : i32
    %c0_i32_0 = arith.constant 0 : i32
    %c0_i32_1 = arith.constant 0 : i32
    %c0_i32_2 = arith.constant 0 : i32
    return %arg1, %c0_i32, %c0_i32_0, %c0_i32_1 : i32, i32, i32, i32
  }
  func.func @transform_6(%arg0: i32, %arg1: i32) -> (i32, i32, i32, i32) {
    %c0_i32 = arith.constant 0 : i32
    %c0_i32_0 = arith.constant 0 : i32
    %c0_i32_1 = arith.constant 0 : i32
    %c0_i32_2 = arith.constant 0 : i32
    return %arg1, %c0_i32, %c0_i32_0, %c0_i32_1 : i32, i32, i32, i32
  }
  func.func @transform_7(%arg0: i32, %arg1: i32) -> (i32, i32, i32) {
    %c0_i32 = arith.constant 0 : i32
    %c0_i32_0 = arith.constant 0 : i32
    %c0_i32_1 = arith.constant 0 : i32
    return %arg1, %c0_i32, %c0_i32_0 : i32, i32, i32
  }
  func.func @transform_8(%arg0: i32, %arg1: i32) -> (i32, i32, i32) {
    %c0_i32 = arith.constant 0 : i32
    %c0_i32_0 = arith.constant 0 : i32
    %c0_i32_1 = arith.constant 0 : i32
    return %arg1, %c0_i32, %c0_i32_0 : i32, i32, i32
  }
  func.func @transform_9(%arg0: i32, %arg1: i32) -> (i32, i32, i32) {
    %c0_i32 = arith.constant 0 : i32
    %c0_i32_0 = arith.constant 0 : i32
    %c0_i32_1 = arith.constant 0 : i32
    return %arg1, %c0_i32, %c0_i32_0 : i32, i32, i32
  }
  func.func @transform_10(%arg0: i32, %arg1: i32) -> (i32, i32) {
    %c0_i32 = arith.constant 0 : i32
    %c0_i32_0 = arith.constant 0 : i32
    %c0_i32_1 = arith.constant 0 : i32
    return %c0_i32, %c0_i32_0 : i32, i32
  }
  func.func @transform_11(%arg0: i32, %arg1: i32) -> (i32, i32) {
    %c0_i32 = arith.constant 0 : i32
    %c0_i32_0 = arith.constant 0 : i32
    %c0_i32_1 = arith.constant 0 : i32
    return %c0_i32, %c0_i32_0 : i32, i32
  }
  func.func @transform_12(%arg0: i32, %arg1: i32) -> (i32, i32, i32) {
    %c0_i32 = arith.constant 0 : i32
    %c0_i32_0 = arith.constant 0 : i32
    %c0_i32_1 = arith.constant 0 : i32
    return %arg0, %c0_i32, %c0_i32_0 : i32, i32, i32
  }
}

</mosaic_0001>

<bundles_post_ra>
// kernel: transformer_forward.1
= control target key start
LH: loop header
LB: loop body
LE: loop exit
PB: predicated region body
PF: predicated region fallthrough
CT: control target
= control target key end

     0   :  { %s5435_s0 = inlined_call_operand.vmem [shape: f32[2,8,12], index: 0, kind: input, shape index: {}]   ;;  %s5436_s1 = inlined_call_operand.vmem [shape: f32[2,1,32], index: 1, kind: input, shape index: {}]   ;;  %s5437_s2 = inlined_call_operand.hbm [shape: bf16[12,32], index: 2, kind: input, shape index: {}]   ;;  %s5438_s3 = inlined_call_operand.vmem [shape: f32[1,32], index: 3, kind: input, shape index: {}]   ;;  %s5439_s4 = inlined_call_operand.vmem [shape: bf16[2,24,8,32], index: 4, kind: input, shape index: {}]   ;;  %s5440_s5 = inlined_call_operand.vmem [shape: f32[2,24,1,8], index: 5, kind: input, shape index: {}]   ;;  %s5441_s6 = inlined_call_operand.vmem [shape: bf16[2,8,8,32], index: 6, kind: input, shape index: {}]   ;;  %s5442_s7 = inlined_call_operand.hbm [shape: bf16[2,32,64], index: 7, kind: input, shape index: {}]   ;;  %s5443_s8 = inlined_call_operand.vmem [shape: bf16[2,64,32], index: 8, kind: input, shape index: {}]   ;;  %s5444_s9 = inlined_call_operand.hbm [shape: f32[2,16,128], index: 9, kind: input, shape index: {}]   ;;  %s5445_s10 = inlined_call_operand.hbm [shape: bf16[32,128], index: 10, kind: input, shape index: {}]   ;;  %s5446_s11 = inlined_call_operand.vmem [shape: f32[1,128], index: 11, kind: input, shape index: {}]   ;;  %s5447_s12 = inlined_call_operand.vmem [shape: f32[2,8,128], index: 12, kind: output, shape index: {}]  }
   0x1   :  { %5459 = sst [smem:[#allocation19_spill]] %s5435_s0 }
   0x2   :  { %5460 = sst [smem:[#allocation20_spill]] %s5437_s2 }
   0x3   :  { %5461 = sst [smem:[#allocation21_spill]] %s5438_s3 }
   0x4   :  { %5462 = sst [smem:[#allocation22_spill]] %s5442_s7 }
   0x5   :  { %5463 = sst [smem:[#allocation23_spill]] %s5444_s9 }
   0x6   :  { %5464 = sst [smem:[#allocation24_spill]] %s5445_s10 }
   0x7   :  { %5465 = sst [smem:[#allocation25_spill]] %s5446_s11 }
   0x8   :  { %5466 = sst [smem:[#allocation26_spill]] %s5447_s12 }
   0x9   :  { %17 = vsyncpa [#allocation5], 0 }
   0xa   :  { %18 = vsyncpa [#allocation7], 0 }
   0xb   :  { %20 = vsyncpa [#allocation7 + $0x1], 0 }
   0xc   :  { %21 = vsyncpa [#allocation10], 0  ;;  %s4750_s21 = smov 0   ;;  %s4752_s22 = smov 0  }
   0xd   :  { %s4754_s23 = smov 0   ;;  %s4756_s24 = smov 0  }
   0xe   :  { %s4758_s25 = smov 0   ;;  %s4760_s26 = smov 0  }
   0xf   :  { %s4762_s27 = smov 0   ;;  %s4764_s28 = smov 0  }
  0x10 LB: > { %5467 = sst [smem:[#allocation14_spill]] %s4661_s26  ;;  %s36_s29 = sadd.s32 1, %s4661_s26  ;;  %s4669_s28 = sphi %s4764_s28, %s27_s28   ;;  %s4665_s27 = sphi %s4762_s27, %s5505_s27   ;;  %s4661_s26 = sphi %s4760_s26, %s5499_s26   ;;  %s4657_s25 = sphi %s4758_s25, %s5498_s25   ;;  %s4653_s24 = sphi %s4756_s24, %s5504_s24   ;;  %s4649_s23 = sphi %s4754_s23, %s5503_s23   ;;  %s4645_s22 = sphi %s4752_s22, %s5502_s22   ;;  %s4641_s21 = sphi %s4750_s21, %s5501_s21  }
  0x11   : > { %5468 = sst [smem:[#allocation15_spill]] %s4665_s27  ;;  %s39_s30 = sadd.s32 1, %s4665_s27 }
  0x12   : > { %p37_p0 = scmp.ge.s32.totalorder %s36_s29, 2  ;;  %s218_s13 = sadd.s32 1, %s4649_s23 }
  0x13   : > { %p225_p1 = scmp.ne.s32.totalorder %s4649_s23, %s4645_s22  ;;  %p226_p2 = scmp.eq.s32.totalorder %s4669_s28, 0 }
  0x14   : > { %s5507_s29 = smov (%p37_p0, %s36_s29), 0  ;;  %s5509_s30 = smov (!%p37_p0, %s39_s30), %s4665_s27 }
  0x15   : > { %5469 = sst [smem:[#allocation16_spill]] %s5507_s29  ;;  %s215_s14 = ssub.s32 %s4661_s26, %s5507_s29 }
  0x16   : > { %p4801_p3 = por %p226_p2, %p225_p1  ;;  %p41_p4 = scmp.ge.s32.totalorder %s5509_s30, 2 }
  0x17   : > { %p216_p5 = scmp.eq.s32.totalorder %s215_s14, 0  ;;  %p4356_p6 = scmp.lt.s32.totalorder %s4669_s28, 4 }
  0x18   : > { %s5511_s30 = smov (%p41_p4, %s5509_s30), 0  ;;  %s443_s17 = sand.u32 1, %s4669_s28  }
  0x19   : > { %5471 = sst [smem:[#allocation17_spill]] %s5511_s30  ;;  %s445_s18 = sand.u32 1, %s4649_s23  }
  0x1a   : > { %s4808_s16 = scalar_select %p216_p5, %s4649_s23, %s218_s13  }
  0x1b   : > { %s4813_s19 = sshll.u32 %s445_s18, 4  ;;  %s5450_s20 = sshll.u32 %s4661_s26, 8 }
  0x1c   : > { %5472 = sst [smem:[#allocation18_spill]] %s4808_s16  ;;  %s447_s3 = scalar_lea.vmem [#allocation6], %s4813_s19 }
  0x1d   : > { %s5473_s7 = sld [smem:[#allocation22_spill]]  ;;  %s454_s12 = sshll.u32 %s447_s3, 4  ;;  %s455_s12 = int_to_ptr.vmem [resolvable:$true] %s454_s12 }
  0x1e   : > { %p4824_p7 = pnand %p4356_p6, %p4801_p3  ;;  %s4828_s13 = scalar_lea.sflag [#allocation7], %s443_s17 }
  0x1f   : > { %s4500_s18 = scalar_lea.vmem %s455_s12, 256  ;;  %s4671_s27 = smov [#allocation6]  }
  0x20   : > { %p5456_p8 = pneg %p4824_p7  ;;  %p4501_p9 = scmp.ne.s32.totalorder %s455_s12, %s4500_s18 }
  0x21   : > { %s4505_s3 = sshll.u32 %s4671_s27, 4  ;;  %s4506_s3 = int_to_ptr.vmem [resolvable:$false] %s4505_s3 }
  0x22   : > { %p4503_p10 = pnand %p4501_p9, %p5456_p8  ;;  %s4507_s29 = scalar_lea.vmem %s4506_s3, 512 }
  0x23   : > { %s453_s11 = scalar_lea.hbm %s5473_s7, %s5450_s20  ;;  %p4508_p12 = scmp.lt.s32.totalorder %s455_s12, %s4506_s3 }
  0x24   : > { %p4504_p11 = pneg %p4503_p10  ;;  %p4509_p13 = scmp.lt.s32.totalorder %s4507_s29, %s4500_s18 }
  0x26   : > { %p4510_p0 = por %p4509_p13, %p4508_p12 }
  0x28   : > { %p4511_p1 = pnand %p4510_p0, %p4504_p11 }
  0x2a   : > { %4514 = shalt.err (!%p4511_p1)
}
  0x2b   : > { %s5452_s15 = smov 64   ;;  %s5454_s17 = smov 4  }
  0x2c   : > { %4350 = dma.hbm_to_vmem [thread:$0]  (!%p4824_p7), %s453_s11, 256, %s455_s12, %s4828_s13, %s5452_s15, %s5452_s15, %s5454_s17  }
  0x2d   : > { %s476_s18 = scalar_lea.vmem [#allocation8], %s4813_s19  ;;  %s5451_s3 = sadd.s32 4294967295, %s4669_s28  }
  0x2e   : > { %s483_s27 = sshll.u32 %s476_s18, 4  ;;  %p231_p2 = scmp.ne.s32.totalorder %s4645_s22, %s4641_s21  ;;  %s4872_s27 = int_to_ptr.vmem [resolvable:$true] %s483_s27 }
  0x2f   : > { %p4847_p3 = scmp.eq.s32.totalorder %s5451_s3, 0  ;;  %p3732_p4 = scmp.ge.s32.totalorder %s4669_s28, 1 }
  0x30   : > { %p362_p5 = scmp.lt.s32.totalorder %s4669_s28, 5  ;;  %s4674_s12 = smov [#allocation4]  }
  0x31   : > { %p4855_p6 = por %p4847_p3, %p231_p2  ;;  %s374_s21 = sshll.u32 %s4674_s12, 4  ;;  %s375_s21 = int_to_ptr.vmem [resolvable:$true] %s374_s21 }
  0x32   : > { %p4859_p9 = pnand %p3732_p4, %p362_p5  ;;  %s5478_s19 = sshll.u32 %s4661_s26, 8 }
  0x33   : > { %s5476_s20 = scalar_select %p4855_p6, 1, 0 }
  0x34   : > { %s5479_s9 = sld [smem:[#allocation23_spill]]  ;;  %p4340_p10 = pneg %p4859_p9 }
  0x35   : > { %s4675_s17 = smov [#allocation9]   ;;  %s4526_s3 = scalar_lea.vmem %s375_s21, 128 }
  0x36   : > { %s390_s7 = sshll.u32 %s4675_s17, 4  ;;  %p4876_p11 = pnand %p4340_p10, %p4847_p3  ;;  %s391_s7 = int_to_ptr.vmem [resolvable:$true] %s390_s7 }
  0x37   : > { %p4527_p13 = scmp.ne.s32.totalorder %s375_s21, %s4526_s3  ;;  %p4534_p2 = scmp.lt.s32.totalorder %s375_s21, %s375_s21 }
  0x38   : > { %p4517_p12 = pneg %p4876_p11  ;;  %p4535_p4 = scmp.lt.s32.totalorder %s4526_s3, %s4526_s3 }
  0x3a   : > { %s4868_s15 = scalar_lea.hbm %s5479_s9, %s5478_s19  ;;  %p4529_p0 = pnand %p4527_p13, %p4517_p12 }
  0x3b   : > { %p4536_p5 = por %p4535_p4, %p4534_p2 }
  0x3c   : > { %p4530_p1 = pneg %p4529_p0 }
  0x3e   : > { %p4537_p8 = pnand %p4536_p5, %p4530_p1 }
  0x40   : > { %4540 = shalt.err (!%p4537_p8)
}
  0x41   : > { %s5481_s17 = smov 4   ;;  %s5482_s12 = smov 64  }
  0x42   : > { %s5483_s2 = sld [smem:[#allocation20_spill]]  ;;  %s4552_s9 = scalar_lea.vmem %s391_s7, 256 }
  0x43   : > { %p4553_p10 = scmp.ne.s32.totalorder %s391_s7, %s4552_s9  ;;  %p4560_p6 = scmp.lt.s32.totalorder %s391_s7, %s391_s7 }
  0x44   : > { %p4561_p2 = scmp.lt.s32.totalorder %s4552_s9, %s4552_s9 }
  0x45   : > { %p4555_p13 = pnand %p4553_p10, %p4517_p12 }
  0x46   : > { %p4562_p1 = por %p4561_p2, %p4560_p6 }
  0x47   : > { %p4556_p0 = pneg %p4555_p13 }
  0x48   : > { %4343 = dma.hbm_to_vmem [thread:$0]  (!%p4876_p11), %s5483_s2, 128, %s375_s21, [#allocation5], %s5482_s12, %s5482_s12, %s5481_s17  }
  0x49   : > { %p4563_p8 = pnand %p4562_p1, %p4556_p0 }
  0x4b   : > { %4566 = shalt.err (!%p4563_p8)
}
  0x4c   : > { %s5484_s10 = sld [smem:[#allocation24_spill]]  ;;  %s4580_s21 = scalar_lea.vmem %s4872_s27, 256 }
  0x4d   : > { %p4581_p12 = scmp.ne.s32.totalorder %s4872_s27, %s4580_s21  ;;  %p5485_p4 = pneg %p4824_p7 }
  0x4e   : > { %s4676_s9 = smov [#allocation8]  }
  0x4f   : > { %p4583_p6 = pnand %p4581_p12, %p5485_p4  ;;  %s4585_s18 = sshll.u32 %s4676_s9, 4  ;;  %s4586_s18 = int_to_ptr.vmem [resolvable:$false] %s4585_s18 }
  0x50   : > { %s4587_s30 = scalar_lea.vmem %s4586_s18, 512  ;;  %p4588_p10 = scmp.lt.s32.totalorder %s4872_s27, %s4586_s18 }
  0x51   : > { %p4584_p5 = pneg %p4583_p6  ;;  %p4589_p13 = scmp.lt.s32.totalorder %s4587_s30, %s4580_s21 }
  0x52   : > { %4346 = dma.hbm_to_vmem [thread:$0]  (!%p4876_p11), %s5484_s10, 256, %s391_s7, [#allocation10], %s5482_s12, %s5482_s12, %s5481_s17  }
  0x53   : > { %p4590_p0 = por %p4589_p13, %p4588_p10 }
  0x55   : > { %p4591_p2 = pnand %p4590_p0, %p4584_p5 }
  0x57   : > { %4594 = shalt.err (!%p4591_p2)
}
  0x58   : > { %s4677_s3 = smov 128   ;;  %s4678_s7 = smov 8  }
  0x59   : > { %4353 = dma.hbm_to_vmem [thread:$0]  (!%p4824_p7), %s4868_s15, 256, %s4872_s27, %s4828_s13, %s4677_s3, %s4677_s3, %s4678_s7  }
  0x5a   : > { %495 = sbr.rel (%p4859_p9) target bundleno = 4167 (0x1047), region = 68 }
  0x5f   : > { %4628 = dma.done.wait (%p4847_p3), [#allocation5], 128  }
  0x60   : > { %4630 = vsyncadd (%p4847_p3), [#allocation5], 4294967168  ;;  %s5486_s17 = sadd.s32 4294967295, %s4669_s28   ;;  %s503_s19 = sand.u32 1, %s4645_s22  }
  0x61   : > { %s501_s12 = sand.u32 1, %s5486_s17   ;;  %s4924_s21 = sshll.u32 %s503_s19, 4 }
  0x62   : > { %s502_s14 = scalar_lea.sflag [#allocation7], %s501_s12  ;;  %p5487_p7 = scmp.ne.s32.totalorder %s5476_s20, 0 }
  0x64   : > { %4632 = dma.done.wait (%p5487_p7), %s502_s14, 512  }
  0x65   : > { %4634 = vsyncadd (%p5487_p7), %s502_s14, 4294966784  ;;  %s4932_s15 = scalar_lea.vmem [#allocation8], %s4924_s21 }
  0x66   : > { %4636 = dma.done.wait (%p4847_p3), [#allocation10], 256  }
  0x67   : > { %4638 = vsyncadd (%p4847_p3), [#allocation10], 4294967040  ;;  %p589_p9 = scmp.lt.s32.totalorder %s4657_s25, 1  ;;  %p596_p11 = scmp.lt.s32.totalorder %s4653_s24, 1 }
  0x68   : > { %s5488_s0 = sld [smem:[#allocation19_spill]]  ;;  %p3754_p3 = scmp.ne.s32.totalorder %s4653_s24, 0 }
  0x69   : > { %s5513_s25 = smov (!%p589_p9, %s4657_s25), 1  ;;  %s5489_s19 = sld [smem:[#allocation26_spill]] }
  0x6a   : > { %s597_s20 = scalar_select %p596_p11, %s4653_s24, 1 }
  0x6b   : > { %s3747_s27 = sshll.u32 %s5513_s25, 3  ;;  %s595_s18 = scalar_lea.vmem %s5436_s1, %s5513_s25 }
  0x6c   : > { %s4326_s7 = smul.u32 96, %s597_s20  ;;  %s3893_s12 = sshll.u32 %s597_s20, 5 }
  0x6d   : > { %s4327_s17 = smul.u32 24, %s597_s20  ;;  %s4960_s26 = scalar_lea.vmem %s5441_s6, %s3893_s12 }
  0x6e   : > { %s592_s29 = scalar_lea.vmem %s5488_s0, %s3747_s27  ;;  %s4955_s13 = scalar_lea.vmem %s5439_s4, %s4326_s7 }
  0x6f   : > { %s4965_s25 = scalar_lea.vmem %s5440_s5, %s4327_s17  ;;  %s4970_s3 = scalar_lea.vmem %s5443_s8, %s3893_s12 }
  0x70   : > { %s4975_s7 = scalar_lea.vmem %s5489_s19, %s3747_s27  ;;  %623 = sbr.rel (%p3754_p3) target bundleno = 321 (0x141), region = 88 }
  0x71   : > { %s5490_s0 = sld [smem:[#allocation21_spill]] (!%p3754_p3) }
  0x75   : > { %vm644_vm0 = vcmask 1045504   ;;  %v4679_v0 = vmov 0.0   ;;  %v4435_v1 = vld [vmem:[#allocation4] sm:$0x3f]   ;;  %v624_v2 = vld [vmem:[%s592_s29] sm:$0xff]  ;;  %vm4680_vm1 = vmmov 0  }
  0x76   : > { %4004 = vmatprep.subr.bf16.mxu0 %v4679_v0  ;;  %4006 = vmatprep.mubr.msk.bf16.mxu0 %vm4680_vm1, %v4679_v0  ;;  %v646_v3 = vsel %vm644_vm0, %v4435_v1, 0  ;;  %v625_v4 = vpack.c.bf16 %v624_v2, %v624_v2  ;;  %vm640_vm2 = vcmask 97280   ;;  %v3758_v7 = vld [vmem:[%s595_s18] ss:$0 sm:$0xff]  ;;  %vm696_vm3 = vcmask 261120  }
  0x77   : > { %4005 = vmatpush3.bf16.msra.mxu0 %v646_v3  ;;  %v3755_v5 = vld [vmem:[%s5490_s0] ss:$0 sm:$0xff] }
  0x7a   : > { %4007 = vmatmul.mubr.msk.bf16.vlgmr.msra.gmra.mxu0 %vm640_vm2, %v625_v4 }
 0x13a   : > { %v682_v6 = vpop.f32.mrf.mxu0 }
 0x13b   : > { %v683_v8 = vadd.f32 %v3755_v5, %v682_v6 }
 0x13c   : > { %v4008_v9 = vpop.f32.mrf.mxu0 }
 0x13d   : > { %v695_v10 = vadd.f32 %v3758_v7, %v683_v8 }
 0x13e   : > { %v685_v11 = vpop.f32.mrf.mxu0 }
 0x13f   : > { %697 = vst.msk [vmem:[#allocation2] sm:$0xff] %vm696_vm3, %v695_v10  ;;  %698 = vst.msk [vmem:[#allocation3] sm:$0xff] %vm696_vm3, %v695_v10 }
 0x140   : > { %v4009_v12 = vpop.f32.mrf.mxu0 }
 0x141 PF: > { %vm708_vm4 = vcmask 261120   ;;  %v734_v20 = vld [vmem:[%s4955_s13] sm:$0xf]  ;;  %v735_v21 = vld [vmem:[%s4955_s13 + $0x4] sm:$0xf]  ;;  %v4681_v22 = vmov 0.0   ;;  %v699_v28 = vlaneseq }
 0x142   : > { %4010 = vmatprep.subr.bf16.mxu0 %v4681_v22  ;;  %4016 = vmatprep.subr.bf16.mxu1 %v4681_v22  ;;  %v770_v23 = vsel %vm708_vm4, %v734_v20, 0  ;;  %v813_v24 = vsel %vm708_vm4, %v735_v21, 0  ;;  %vm4682_vm5 = vmmov 0   ;;  %v5004_v31 = vld [vmem:[%s4932_s15] sm:$0xff]  ;;  %v3767_v44 = vld [vmem:[%s4955_s13 + $0x10] sm:$0xf] }
 0x143   : > { %4011 = vmatpush3.bf16.xpose.msra.mxu0 %v770_v23  ;;  %4017 = vmatpush3.bf16.xpose.msra.mxu1 %v813_v24  ;;  %v5000_v29 = vshrl.u32 %v699_v28, 7  ;;  %v736_v38 = vld [vmem:[%s4955_s13 + $0x8] sm:$0xf]  ;;  %v737_v39 = vld [vmem:[%s4955_s13 + $0xc] sm:$0xf]  ;;  %v976_v46 = vsel %vm708_vm4, %v3767_v44, 0 }
 0x144   : > { %4022 = vmatprep.subr.bf16.mxu0 %v4681_v22  ;;  %4028 = vmatprep.subr.bf16.mxu1 %v4681_v22  ;;  %v856_v42 = vsel %vm708_vm4, %v736_v38, 0  ;;  %v899_v43 = vsel %vm708_vm4, %v737_v39, 0  ;;  %v3768_v45 = vld [vmem:[%s4955_s13 + $0x14] sm:$0xf]  ;;  %v3769_v48 = vld [vmem:[%s4955_s13 + $0x18] sm:$0xf] }
 0x145   : > { %4012 = vmatprep.mubr.msk.bf16.mxu0 %vm4682_vm5, %v4681_v22  ;;  %4018 = vmatprep.mubr.msk.bf16.mxu1 %vm4682_vm5, %v4681_v22  ;;  %v725_v30 = vsub.s32 0, %v5000_v29  ;;  %v730_v32 = vsub.s32 1, %v5000_v29  ;;  %v1019_v47 = vsel %vm708_vm4, %v3768_v45, 0  ;;  %v3770_v49 = vld [vmem:[%s4955_s13 + $0x1c] sm:$0xf]  ;;  %v1062_v50 = vsel %vm708_vm4, %v3769_v48, 0 }
 0x146   : > { %v4981_v13 = vld [vmem:[#allocation2] sm:$0xff]  ;;  %v1105_v51 = vsel %vm708_vm4, %v3770_v49, 0  ;;  %v3785_v56 = vld [vmem:[%s4955_s13 + $0x28] sm:$0xf]  ;;  %v3786_v57 = vld [vmem:[%s4955_s13 + $0x2c] sm:$0xf] }
 0x147   : > { %v709_v14 = vsel %vm708_vm4, %v4981_v13, 0.0  ;;  %v726_v33 = vrot.slane %v5004_v31, %v725_v30  ;;  %v731_v36 = vrot.slane %v5004_v31, %v730_v32  ;;  %v3783_v52 = vld [vmem:[%s4955_s13 + $0x20] sm:$0xf]  ;;  %v3784_v53 = vld [vmem:[%s4955_s13 + $0x24] sm:$0xf]  ;;  %v1268_v58 = vsel %vm708_vm4, %v3785_v56, 0 }
 0x148   : > { %710 = vadd.xlane.f32.xlu0 %v709_v14  ;;  %v1182_v54 = vsel %vm708_vm4, %v3783_v52, 0  ;;  %v1225_v55 = vsel %vm708_vm4, %v3784_v53, 0  ;;  %v1311_v59 = vsel %vm708_vm4, %v3786_v57, 0  ;;  %v3775_v12 = vld [vmem:[%s4965_s25 + $0x4] ss:$0 sm:$0xff]  ;;  %vm1361_vm6 = vcmask 64512  }
 0x149   : > { %v3776_v14 = vld [vmem:[%s4965_s25 + $0x5] ss:$0 sm:$0xff]  ;;  %v3759_v24 = vld [vmem:[%s4965_s25] ss:$0 sm:$0xff]  ;;  %v3778_v38 = vld [vmem:[%s4965_s25 + $0x7] ss:$0 sm:$0xff] }
 0x14a   : > { %v3762_v52 = vld [vmem:[%s4965_s25 + $0x3] ss:$0 sm:$0xff]  ;;  %vm1611_vm7 = vcmask 1043456   ;;  %vm3410_vm9 = vcmask 523264   ;;  %p3883_p1 = scmp.ne.s32.totalorder %s4653_s24, 1 }
 0x1d1   : > { %v711_v15 = vpop.xlane.xlu0 %710 }
 0x1d2   : > { %v713_v16 = vmul.f32 0.03125, %v711_v15 }
 0x1d4   : > { %v714_v17 = vsub.f32 %v4981_v13, %v713_v16 }
 0x1d6   : > { %v715_v18 = vmul.f32 %v714_v17, %v714_v17 }
 0x1d8   : > { %v716_v19 = vsel %vm708_vm4, %v715_v18, 0.0 }
 0x1d9   : > { %717 = vadd.xlane.f32.xlu0 %v716_v19 }
 0x262   : > { %v718_v25 = vpop.xlane.xlu0 %717 }
 0x263   : > { %v719_v26 = vmul.f32 0.03125, %v718_v25  ;;  %v3760_v25 = vld [vmem:[%s4965_s25 + $0x1] ss:$0 sm:$0xff] }
 0x265   : > { %v720_v27 = vadd.f32 1e-05, %v719_v26 }
 0x267   : > { %4442 = vrsqrt.f32 %v720_v27 }
 0x274   : > { %v4443_v34 = vpop.eup %4442 }
 0x275   : > { %v722_v35 = vmul.f32 %v4443_v34, %v714_v17 }
 0x277   : > { %v727_v37 = vmul.f32 %v726_v33, %v722_v35 }
 0x279   : > { %v732_v40 = vadd.f32 %v731_v36, %v727_v37  ;;  %v3777_v37 = vld [vmem:[%s4965_s25 + $0x6] ss:$0 sm:$0xff] }
 0x27b   : > { %v733_v41 = vpack.c.bf16 %v732_v40, %v732_v40 }
 0x27d   : > { %4013 = vmatmul.mubr.msk.bf16.vlgmr.msra.gmra.mxu0 %vm708_vm4, %v733_v41  ;;  %4019 = vmatmul.mubr.msk.bf16.vlgmr.msra.gmra.mxu1 %vm708_vm4, %v733_v41 }
 0x27e   : > { %4023 = vmatpush3.bf16.xpose.msra.mxu0 %v856_v42  ;;  %4029 = vmatpush3.bf16.xpose.msra.mxu1 %v899_v43 }
 0x27f   : > { %4024 = vmatprep.mubr.msk.bf16.mxu0 %vm4682_vm5, %v4681_v22  ;;  %4030 = vmatprep.mubr.msk.bf16.mxu1 %vm4682_vm5, %v4681_v22 }
 0x280   : > { %4034 = vmatprep.subr.bf16.mxu0 %v4681_v22  ;;  %4040 = vmatprep.subr.bf16.mxu1 %v4681_v22 }
 0x285   : > { %4025 = vmatmul.mubr.msk.bf16.vlgmr.msra.gmra.mxu0 %vm708_vm4, %v733_v41  ;;  %4031 = vmatmul.mubr.msk.bf16.vlgmr.msra.gmra.mxu1 %vm708_vm4, %v733_v41 }
 0x286   : > { %4035 = vmatpush3.bf16.xpose.msra.mxu0 %v976_v46  ;;  %4041 = vmatpush3.bf16.xpose.msra.mxu1 %v1019_v47 }
 0x287   : > { %4036 = vmatprep.mubr.msk.bf16.mxu0 %vm4682_vm5, %v4681_v22  ;;  %4042 = vmatprep.mubr.msk.bf16.mxu1 %vm4682_vm5, %v4681_v22 }
 0x288   : > { %4046 = vmatprep.subr.bf16.mxu0 %v4681_v22  ;;  %4052 = vmatprep.subr.bf16.mxu1 %v4681_v22 }
 0x28d   : > { %4037 = vmatmul.mubr.msk.bf16.vlgmr.msra.gmra.mxu0 %vm708_vm4, %v733_v41  ;;  %4043 = vmatmul.mubr.msk.bf16.vlgmr.msra.gmra.mxu1 %vm708_vm4, %v733_v41 }
 0x28e   : > { %4047 = vmatpush3.bf16.xpose.msra.mxu0 %v1062_v50  ;;  %4053 = vmatpush3.bf16.xpose.msra.mxu1 %v1105_v51  ;;  %v3761_v51 = vld [vmem:[%s4965_s25 + $0x2] ss:$0 sm:$0xff] }
 0x28f   : > { %4048 = vmatprep.mubr.msk.bf16.mxu0 %vm4682_vm5, %v4681_v22  ;;  %4054 = vmatprep.mubr.msk.bf16.mxu1 %vm4682_vm5, %v4681_v22 }
 0x290   : > { %4058 = vmatprep.subr.bf16.mxu0 %v4681_v22  ;;  %4064 = vmatprep.subr.bf16.mxu1 %v4681_v22 }
 0x295   : > { %4049 = vmatmul.mubr.msk.bf16.vlgmr.msra.gmra.mxu0 %vm708_vm4, %v733_v41  ;;  %4055 = vmatmul.mubr.msk.bf16.vlgmr.msra.gmra.mxu1 %vm708_vm4, %v733_v41 }
 0x296   : > { %4059 = vmatpush3.bf16.xpose.msra.mxu0 %v1182_v54  ;;  %4065 = vmatpush3.bf16.xpose.msra.mxu1 %v1225_v55 }
 0x297   : > { %4060 = vmatprep.mubr.msk.bf16.mxu0 %vm4682_vm5, %v4681_v22  ;;  %4066 = vmatprep.mubr.msk.bf16.mxu1 %vm4682_vm5, %v4681_v22 }
 0x298   : > { %4070 = vmatprep.subr.bf16.mxu0 %v4681_v22  ;;  %4076 = vmatprep.subr.bf16.mxu1 %v4681_v22 }
 0x29d   : > { %4061 = vmatmul.mubr.msk.bf16.vlgmr.msra.gmra.mxu0 %vm708_vm4, %v733_v41  ;;  %4067 = vmatmul.mubr.msk.bf16.vlgmr.msra.gmra.mxu1 %vm708_vm4, %v733_v41 }
 0x29e   : > { %4071 = vmatpush3.bf16.xpose.msra.mxu0 %v1268_v58  ;;  %4077 = vmatpush3.bf16.xpose.msra.mxu1 %v1311_v59  ;;  %v3791_v59 = vld [vmem:[%s4965_s25 + $0x8] ss:$0 sm:$0xff] }
 0x29f   : > { %4072 = vmatprep.mubr.msk.bf16.mxu0 %vm4682_vm5, %v4681_v22  ;;  %4078 = vmatprep.mubr.msk.bf16.mxu1 %vm4682_vm5, %v4681_v22 }
 0x2a0   : > { %4082 = vmatprep.subr.bf16.mxu0 %v4681_v22  ;;  %4088 = vmatprep.subr.bf16.mxu1 %v4681_v22 }
 0x2a5   : > { %4073 = vmatmul.mubr.msk.bf16.vlgmr.msra.gmra.mxu0 %vm708_vm4, %v733_v41  ;;  %4079 = vmatmul.mubr.msk.bf16.vlgmr.msra.gmra.mxu1 %vm708_vm4, %v733_v41 }
 0x2a6   : > { %4084 = vmatprep.mubr.msk.bf16.mxu0 %vm4682_vm5, %v4681_v22  ;;  %4090 = vmatprep.mubr.msk.bf16.mxu1 %vm4682_vm5, %v4681_v22 }
 0x33d   : > { %v806_v60 = vpop.f32.mrf.mxu0  ;;  %v849_v61 = vpop.f32.mrf.mxu1 }
 0x33e   : > { %v807_v39 = vadd.f32 %v3759_v24, %v806_v60  ;;  %v850_v40 = vadd.f32 %v3760_v25, %v849_v61  ;;  %v3792_v60 = vld [vmem:[%s4965_s25 + $0x9] ss:$0 sm:$0xff]  ;;  %v5118_v25 = vand.u32 127, %v699_v28 }
 0x33f   : > { %v4014_v62 = vpop.f32.mrf.mxu0  ;;  %v4020_v63 = vpop.f32.mrf.mxu1 }
 0x340   : > { %v1353_v47 = vpack.c.bf16 %v807_v39, %v807_v39  ;;  %v1354_v48 = vpack.c.bf16 %v850_v40, %v850_v40  ;;  %vm5122_vm8 = vcmp.gt.s32.totalorder %v5118_v25, %v5000_v29 }
 0x341   : > { %v809_v0 = vpop.f32.mrf.mxu0  ;;  %v852_v1 = vpop.f32.mrf.mxu1 }
 0x343   : > { %v4015_v2 = vpop.f32.mrf.mxu0  ;;  %v4021_v3 = vpop.f32.mrf.mxu1 }
 0x345   : > { %v892_v4 = vpop.f32.mrf.mxu0  ;;  %v935_v5 = vpop.f32.mrf.mxu1 }
 0x346   : > { %v893_v61 = vadd.f32 %v3761_v51, %v892_v4  ;;  %v936_v62 = vadd.f32 %v3762_v52, %v935_v5 }
 0x347   : > { %v4026_v6 = vpop.f32.mrf.mxu0  ;;  %v4032_v7 = vpop.f32.mrf.mxu1 }
 0x348   : > { %v1355_v7 = vpack.c.bf16 %v893_v61, %v893_v61  ;;  %v1356_v4 = vpack.c.bf16 %v936_v62, %v936_v62 }
 0x349   : > { %v895_v8 = vpop.f32.mrf.mxu0  ;;  %v938_v9 = vpop.f32.mrf.mxu1 }
 0x34b   : > { %v4027_v10 = vpop.f32.mrf.mxu0  ;;  %v4033_v11 = vpop.f32.mrf.mxu1 }
 0x34d   : > { %v1012_v15 = vpop.f32.mrf.mxu0  ;;  %v1055_v16 = vpop.f32.mrf.mxu1 }
 0x34e   : > { %v1013_v17 = vadd.f32 %v3775_v12, %v1012_v15  ;;  %v1056_v18 = vadd.f32 %v3776_v14, %v1055_v16 }
 0x34f   : > { %v4038_v19 = vpop.f32.mrf.mxu0  ;;  %v4044_v20 = vpop.f32.mrf.mxu1 }
 0x350   : > { %v1357_v21 = vpack.c.bf16 %v1013_v17, %v1013_v17  ;;  %v1358_v23 = vpack.c.bf16 %v1056_v18, %v1056_v18 }
 0x351   : > { %v1015_v26 = vpop.f32.mrf.mxu0  ;;  %v1058_v27 = vpop.f32.mrf.mxu1 }
 0x352   : > { %v1366_v33 = vsel %vm1361_vm6, %v1357_v21, 0  ;;  %v1412_v34 = vsel %vm1361_vm6, %v1358_v23, 0 }
 0x353   : > { %v4039_v35 = vpop.f32.mrf.mxu0  ;;  %v4045_v36 = vpop.f32.mrf.mxu1  ;;  %4083 = vmatpush3.bf16.xpose.msra.mxu0 %v1366_v33  ;;  %4089 = vmatpush3.bf16.xpose.msra.mxu1 %v1412_v34 }
 0x354   : > { %4094 = vmatprep.subr.bf16.mxu0 %v4681_v22  ;;  %4100 = vmatprep.subr.bf16.mxu1 %v4681_v22 }
 0x355   : > { %v1098_v41 = vpop.f32.mrf.mxu0  ;;  %v1141_v42 = vpop.f32.mrf.mxu1 }
 0x356   : > { %v1099_v43 = vadd.f32 %v3777_v37, %v1098_v41  ;;  %v1142_v44 = vadd.f32 %v3778_v38, %v1141_v42 }
 0x357   : > { %v4050_v45 = vpop.f32.mrf.mxu0  ;;  %v4056_v46 = vpop.f32.mrf.mxu1 }
 0x358   : > { %v1359_v49 = vpack.c.bf16 %v1099_v43, %v1099_v43  ;;  %v1360_v50 = vpack.c.bf16 %v1142_v44, %v1142_v44 }
 0x359   : > { %v1101_v53 = vpop.f32.mrf.mxu0  ;;  %v1144_v54 = vpop.f32.mrf.mxu1 }
 0x35a   : > { %v1458_v55 = vsel %vm1361_vm6, %v1359_v49, 0  ;;  %v1504_v56 = vsel %vm1361_vm6, %v1360_v50, 0  ;;  %4085 = vmatmul.mubr.msk.bf16.vlgmr.msra.gmra.mxu0 %vm1361_vm6, %v1353_v47  ;;  %4091 = vmatmul.mubr.msk.bf16.vlgmr.msra.gmra.mxu1 %vm1361_vm6, %v1354_v48 }
 0x35b   : > { %v4051_v57 = vpop.f32.mrf.mxu0  ;;  %v4057_v58 = vpop.f32.mrf.mxu1  ;;  %4095 = vmatpush3.bf16.xpose.msra.mxu0 %v1458_v55  ;;  %4101 = vmatpush3.bf16.xpose.msra.mxu1 %v1504_v56 }
 0x35c   : > { %4096 = vmatprep.mubr.msk.bf16.mxu0 %vm4682_vm5, %v4681_v22  ;;  %4102 = vmatprep.mubr.msk.bf16.mxu1 %vm4682_vm5, %v4681_v22 }
 0x35d   : > { %v1218_v63 = vpop.f32.mrf.mxu0  ;;  %v1261_v0 = vpop.f32.mrf.mxu1  ;;  %4106 = vmatprep.subr.bf16.mxu0 %v4681_v22  ;;  %4112 = vmatprep.subr.bf16.mxu1 %v4681_v22 }
 0x35e   : > { %v1219_v1 = vadd.f32 %v3791_v59, %v1218_v63  ;;  %v1262_v2 = vadd.f32 %v3792_v60, %v1261_v0 }
 0x35f   : > { %v4062_v3 = vpop.f32.mrf.mxu0  ;;  %v4068_v6 = vpop.f32.mrf.mxu1 }
 0x360   : > { %v1604_v5 = vpack.c.bf16 %v1219_v1, %v1219_v1  ;;  %v1605_v8 = vpack.c.bf16 %v1262_v2, %v1262_v2 }
 0x361   : > { %v1221_v9 = vpop.f32.mrf.mxu0  ;;  %v1264_v10 = vpop.f32.mrf.mxu1 }
 0x362   : > { %v1613_v11 = vsel %vm1611_vm7, %v1604_v5, 0  ;;  %v1659_v12 = vsel %vm1611_vm7, %v1605_v8, 0  ;;  %4097 = vmatmul.mubr.msk.bf16.vlgmr.msra.gmra.mxu0 %vm1361_vm6, %v1355_v7  ;;  %4103 = vmatmul.mubr.msk.bf16.vlgmr.msra.gmra.mxu1 %vm1361_vm6, %v1356_v4 }
 0x363   : > { %v4063_v14 = vpop.f32.mrf.mxu0  ;;  %v4069_v15 = vpop.f32.mrf.mxu1  ;;  %4107 = vmatpush3.bf16.msra.mxu0 %v1613_v11  ;;  %4113 = vmatpush3.bf16.msra.mxu1 %v1659_v12 }
 0x364   : > { %4108 = vmatprep.mubr.msk.bf16.mxu0 %vm4682_vm5, %v4681_v22  ;;  %4118 = vmatprep.subr.bf16.mxu0 %v4681_v22 }
 0x365   : > { %v5110_v16 = vpop.f32.mrf.mxu0  ;;  %v5112_v17 = vpop.f32.mrf.mxu1  ;;  %4114 = vmatprep.mubr.msk.bf16.mxu1 %vm4682_vm5, %v4681_v22  ;;  %4124 = vmatprep.subr.bf16.mxu1 %v4681_v22 }
 0x367   : > { %v4074_v18 = vpop.f32.mrf.mxu0  ;;  %v4080_v19 = vpop.f32.mrf.mxu1 }
 0x369   : > { %v1307_v20 = vpop.f32.mrf.mxu0  ;;  %v1350_v21 = vpop.f32.mrf.mxu1 }
 0x36a   : > { %v3793_v20 = vld [vmem:[%s4965_s25 + $0xa] ss:$0 sm:$0xff] }
 0x36b   : > { %v4075_v23 = vpop.f32.mrf.mxu0  ;;  %v4081_v24 = vpop.f32.mrf.mxu1 }
 0x36c   : > { %v1305_v24 = vadd.f32 %v3793_v20, %v5110_v16 }
 0x41a   : > { %v1402_v26 = vpop.f32.mrf.mxu0  ;;  %v1448_v27 = vpop.f32.mrf.mxu1 }
 0x41b   : > { %v1546_v34 = vmul.f32 0.35355338, %v1402_v26  ;;  %v1547_v35 = vmul.f32 0.35355338, %v1448_v27  ;;  %v3794_v26 = vld [vmem:[%s4965_s25 + $0xb] ss:$0 sm:$0xff] }
 0x41c   : > { %v4086_v36 = vpop.f32.mrf.mxu0  ;;  %v4092_v37 = vpop.f32.mrf.mxu1 }
 0x41d   : > { %v1552_v38 = vsel %vm5122_vm8, -1e+30, %v1546_v34  ;;  %v1553_v41 = vsel %vm5122_vm8, -1e+30, %v1547_v35  ;;  %v1606_v34 = vpack.c.bf16 %v1305_v24, %v1305_v24  ;;  %v1348_v35 = vadd.f32 %v3794_v26, %v5112_v17 }
 0x41e   : > { %v1405_v39 = vpop.f32.mrf.mxu0  ;;  %v1451_v40 = vpop.f32.mrf.mxu1  ;;  %v1556_v28 = vsel %vm1361_vm6, %v1552_v38, -inf  ;;  %v1559_v46 = vsel %vm1361_vm6, %v1553_v41, -inf  ;;  %v1994_v24 = vsub.s32 6, %v5000_v29 }
 0x41f   : > { %1557 = vmax.xlane.f32.xlu1 %v1556_v28  ;;  %v1705_v39 = vsel %vm1611_vm7, %v1606_v34, 0  ;;  %v1607_v40 = vpack.c.bf16 %v1348_v35, %v1348_v35 }
 0x420   : > { %v4087_v42 = vpop.f32.mrf.mxu0  ;;  %v4093_v43 = vpop.f32.mrf.mxu1 }
 0x421   : > { %v1793_v42 = vld [vmem:[%s4960_s26] sm:$0xf]  ;;  %v1751_v17 = vsel %vm1611_vm7, %v1607_v40, 0  ;;  %v1995_v40 = vrot.slane %v5004_v31, %v1994_v24  ;;  %v3845_v24 = vld [vmem:[%s4955_s13 + $0x58] sm:$0xf] }
 0x422   : > { %v1494_v44 = vpop.f32.mrf.mxu0  ;;  %v1540_v45 = vpop.f32.mrf.mxu1 }
 0x423   : > { %v1548_v47 = vmul.f32 0.35355338, %v1494_v44  ;;  %v1549_v48 = vmul.f32 0.35355338, %v1540_v45  ;;  %1560 = vmax.xlane.f32.xlu1 %v1559_v46 }
 0x424   : > { %v4098_v49 = vpop.f32.mrf.mxu0  ;;  %v4104_v50 = vpop.f32.mrf.mxu1 }
 0x425   : > { %v1554_v51 = vsel %vm5122_vm8, -1e+30, %v1548_v47  ;;  %v1555_v52 = vsel %vm5122_vm8, -1e+30, %v1549_v48  ;;  %v1805_v47 = vsel %vm1611_vm7, %v1793_v42, 0 }
 0x426   : > { %v1497_v53 = vpop.f32.mrf.mxu0  ;;  %v1543_v54 = vpop.f32.mrf.mxu1  ;;  %v1562_v55 = vsel %vm1361_vm6, %v1554_v51, -inf  ;;  %v1565_v56 = vsel %vm1361_vm6, %v1555_v52, -inf  ;;  %v1794_v49 = vld [vmem:[%s4960_s26 + $0x4] sm:$0xf] }
 0x427   : > { %1563 = vmax.xlane.f32.xlu0 %v1562_v55  ;;  %1566 = vmax.xlane.f32.xlu1 %v1565_v56  ;;  %v1851_v50 = vsel %vm1611_vm7, %v1794_v49, 0  ;;  %v1796_v56 = vld [vmem:[%s4960_s26 + $0xc] sm:$0xf] }
 0x428   : > { %v4099_v57 = vpop.f32.mrf.mxu0  ;;  %v4105_v58 = vpop.f32.mrf.mxu1 }
 0x4a8   : > { %v1558_v59 = vpop.xlane.xlu1 %1557 }
 0x4a9   : > { %v1568_v60 = vsub.f32 %v1552_v38, %v1558_v59 }
 0x4ab   : > { %v1572_v61 = vmul.f32 1.442695, %v1568_v60  ;;  %v1943_v60 = vsel %vm1611_vm7, %v1796_v56, 0 }
 0x4ac   : > { %v1561_v62 = vpop.xlane.xlu1 %1560 }
 0x4ad   : > { %4444 = vpow2.f32 %v1572_v61  ;;  %v1569_v63 = vsub.f32 %v1553_v41, %v1561_v62 }
 0x4af   : > { %v1574_v0 = vmul.f32 1.442695, %v1569_v63 }
 0x4b0   : > { %v1564_v1 = vpop.xlane.xlu0 %1563  ;;  %v1567_v2 = vpop.xlane.xlu1 %1566 }
 0x4b1   : > { %4446 = vpow2.f32 %v1574_v0  ;;  %v1570_v3 = vsub.f32 %v1554_v51, %v1564_v1  ;;  %v1571_v6 = vsub.f32 %v1555_v52, %v1567_v2  ;;  %v1795_v51 = vld [vmem:[%s4960_s26 + $0x8] sm:$0xf] }
 0x4b2   : > { %v1897_v54 = vsel %vm1611_vm7, %v1795_v51, 0 }
 0x4b3   : > { %v1576_v7 = vmul.f32 1.442695, %v1570_v3  ;;  %v1578_v4 = vmul.f32 1.442695, %v1571_v6 }
 0x4b5   : > { %4448 = vpow2.f32 %v1576_v7 }
 0x4b6   : > { %4450 = vpow2.f32 %v1578_v4 }
 0x4ba   : > { %v4445_v5 = vpop.eup %4444 }
 0x4bb   : > { %v1580_v8 = vsel %vm1361_vm6, %v4445_v5, 0.0 }
 0x4bc   : > { %1581 = vadd.xlane.f32.xlu0 %v1580_v8 }
 0x4be   : > { %v4447_v9 = vpop.eup %4446 }
 0x4bf   : > { %v1583_v10 = vsel %vm1361_vm6, %v4447_v9, 0.0 }
 0x4c0   : > { %1584 = vadd.xlane.f32.xlu1 %v1583_v10 }
 0x4c2   : > { %v4449_v11 = vpop.eup %4448 }
 0x4c3   : > { %v4451_v12 = vpop.eup %4450  ;;  %v1586_v14 = vsel %vm1361_vm6, %v4449_v11, 0.0 }
 0x4c4   : > { %1587 = vadd.xlane.f32.xlu0 %v1586_v14  ;;  %v1589_v15 = vsel %vm1361_vm6, %v4451_v12, 0.0 }
 0x4c5   : > { %1590 = vadd.xlane.f32.xlu1 %v1589_v15 }
 0x545   : > { %v1582_v18 = vpop.xlane.xlu0 %1581 }
 0x546   : > { %4452 = vrcp.f32 %v1582_v18 }
 0x549   : > { %v1585_v19 = vpop.xlane.xlu1 %1584 }
 0x54a   : > { %4454 = vrcp.f32 %v1585_v19 }
 0x54d   : > { %v1588_v21 = vpop.xlane.xlu0 %1587 }
 0x54e   : > { %4456 = vrcp.f32 %v1588_v21  ;;  %v1591_v23 = vpop.xlane.xlu1 %1590 }
 0x54f   : > { %4458 = vrcp.f32 %v1591_v23 }
 0x553   : > { %v4453_v27 = vpop.eup %4452 }
 0x554   : > { %v1596_v36 = vmul.f32 %v4453_v27, %v4445_v5 }
 0x556   : > { %v1600_v37 = vpack.c.bf16 %v1596_v36, %v1596_v36 }
 0x557   : > { %v4455_v38 = vpop.eup %4454 }
 0x558   : > { %4109 = vmatmul.mubr.msk.bf16.vlgmr.msra.gmra.mxu0 %vm1361_vm6, %v1600_v37  ;;  %v1597_v28 = vmul.f32 %v4455_v38, %v4447_v9 }
 0x559   : > { %4119 = vmatpush3.bf16.msra.mxu0 %v1705_v39  ;;  %4120 = vmatprep.mubr.msk.bf16.mxu0 %vm4682_vm5, %v4681_v22 }
 0x55a   : > { %v1601_v16 = vpack.c.bf16 %v1597_v28, %v1597_v28  ;;  %4130 = vmatprep.subr.bf16.mxu0 %v4681_v22 }
 0x55b   : > { %v4457_v41 = vpop.eup %4456 }
 0x55c   : > { %v4459_v43 = vpop.eup %4458  ;;  %4115 = vmatmul.mubr.msk.bf16.vlgmr.msra.gmra.mxu1 %vm1361_vm6, %v1601_v16  ;;  %v1598_v44 = vmul.f32 %v4457_v41, %v4449_v11 }
 0x55d   : > { %4125 = vmatpush3.bf16.msra.mxu1 %v1751_v17  ;;  %4126 = vmatprep.mubr.msk.bf16.mxu1 %vm4682_vm5, %v4681_v22  ;;  %v1599_v46 = vmul.f32 %v4459_v43, %v4451_v12 }
 0x55e   : > { %v1602_v45 = vpack.c.bf16 %v1598_v44, %v1598_v44  ;;  %4136 = vmatprep.subr.bf16.mxu1 %v4681_v22 }
 0x55f   : > { %v1603_v48 = vpack.c.bf16 %v1599_v46, %v1599_v46 }
 0x560   : > { %4121 = vmatmul.mubr.msk.bf16.vlgmr.msra.gmra.mxu0 %vm1361_vm6, %v1602_v45 }
 0x561   : > { %4131 = vmatpush3.bf16.msra.mxu0 %v1805_v47  ;;  %4132 = vmatprep.mubr.msk.bf16.mxu0 %vm4682_vm5, %v4681_v22 }
 0x562   : > { %4142 = vmatprep.subr.bf16.mxu0 %v4681_v22 }
 0x564   : > { %4127 = vmatmul.mubr.msk.bf16.vlgmr.msra.gmra.mxu1 %vm1361_vm6, %v1603_v48 }
 0x565   : > { %4138 = vmatprep.mubr.msk.bf16.mxu1 %vm4682_vm5, %v4681_v22  ;;  %4137 = vmatpush3.bf16.msra.mxu1 %v1851_v50 }
 0x566   : > { %4148 = vmatprep.subr.bf16.mxu1 %v4681_v22 }
 0x618   : > { %v1649_v52 = vpop.f32.mrf.mxu0 }
 0x619   : > { %v1797_v53 = vpack.c.bf16 %v1649_v52, %v1649_v52  ;;  %v3811_v52 = vld [vmem:[%s4955_s13 + $0x30] sm:$0xf] }
 0x61a   : > { %v4110_v55 = vpop.f32.mrf.mxu0 }
 0x61b   : > { %4133 = vmatmul.mubr.msk.bf16.vlgmr.msra.gmra.mxu0 %vm1361_vm6, %v1797_v53  ;;  %v3812_v53 = vld [vmem:[%s4955_s13 + $0x34] sm:$0xf] }
 0x61c   : > { %v1652_v57 = vpop.f32.mrf.mxu0  ;;  %v1695_v58 = vpop.f32.mrf.mxu1  ;;  %4143 = vmatpush3.bf16.msra.mxu0 %v1897_v54  ;;  %4144 = vmatprep.mubr.msk.bf16.mxu0 %vm4682_vm5, %v4681_v22  ;;  %v2061_v54 = vsel %vm708_vm4, %v3811_v52, 0  ;;  %v2104_v55 = vsel %vm708_vm4, %v3812_v53, 0 }
 0x61d   : > { %v1798_v59 = vpack.c.bf16 %v1695_v58, %v1695_v58  ;;  %4154 = vmatprep.subr.bf16.mxu0 %v4681_v22  ;;  %v2013_v58 = vsub.s32 2, %v5000_v29 }
 0x61e   : > { %v4111_v61 = vpop.f32.mrf.mxu0  ;;  %v4116_v62 = vpop.f32.mrf.mxu1 }
 0x61f   : > { %4139 = vmatmul.mubr.msk.bf16.vlgmr.msra.gmra.mxu1 %vm1361_vm6, %v1798_v59  ;;  %v2018_v59 = vsub.s32 3, %v5000_v29 }
 0x620   : > { %v1698_v63 = vpop.f32.mrf.mxu1  ;;  %v1741_v0 = vpop.f32.mrf.mxu0  ;;  %4149 = vmatpush3.bf16.msra.mxu1 %v1943_v60  ;;  %4150 = vmatprep.mubr.msk.bf16.mxu1 %vm4682_vm5, %v4681_v22  ;;  %v2014_v60 = vrot.slane %v5004_v31, %v2013_v58  ;;  %v3819_v58 = vld [vmem:[%s4965_s25 + $0xc] ss:$0 sm:$0xff] }
 0x621   : > { %v1799_v1 = vpack.c.bf16 %v1741_v0, %v1741_v0  ;;  %4160 = vmatprep.subr.bf16.mxu1 %v4681_v22  ;;  %v2019_v63 = vrot.slane %v5004_v31, %v2018_v59  ;;  %v3827_v31 = vld [vmem:[%s4955_s13 + $0x40] sm:$0xf]  ;;  %v3820_v59 = vld [vmem:[%s4965_s25 + $0xd] ss:$0 sm:$0xff] }
 0x622   : > { %v4117_v2 = vpop.f32.mrf.mxu1  ;;  %v4122_v3 = vpop.f32.mrf.mxu0 }
 0x623   : > { %4145 = vmatmul.mubr.msk.bf16.vlgmr.msra.gmra.mxu0 %vm1361_vm6, %v1799_v1  ;;  %v3813_v1 = vld [vmem:[%s4955_s13 + $0x38] sm:$0xf]  ;;  %v3814_v2 = vld [vmem:[%s4955_s13 + $0x3c] sm:$0xf] }
 0x624   : > { %v1744_v6 = vpop.f32.mrf.mxu0  ;;  %v1787_v7 = vpop.f32.mrf.mxu1  ;;  %4156 = vmatprep.mubr.msk.bf16.mxu0 %vm4682_vm5, %v4681_v22  ;;  %4155 = vmatpush3.bf16.xpose.msra.mxu0 %v2061_v54 }
 0x625   : > { %v1800_v4 = vpack.c.bf16 %v1787_v7, %v1787_v7  ;;  %4166 = vmatprep.subr.bf16.mxu0 %v4681_v22  ;;  %v2147_v7 = vsel %vm708_vm4, %v3813_v1, 0 }
 0x626   : > { %v4123_v5 = vpop.f32.mrf.mxu0  ;;  %v4128_v8 = vpop.f32.mrf.mxu1 }
 0x627   : > { %4151 = vmatmul.mubr.msk.bf16.vlgmr.msra.gmra.mxu1 %vm1361_vm6, %v1800_v4  ;;  %v2190_v4 = vsel %vm708_vm4, %v3814_v2, 0  ;;  %v3828_v5 = vld [vmem:[%s4955_s13 + $0x44] sm:$0xf]  ;;  %v2270_v8 = vsel %vm708_vm4, %v3827_v31, 0  ;;  %v3837_v2 = vld [vmem:[%s4965_s25 + $0x12] ss:$0 sm:$0xff] }
 0x628   : > { %v1790_v9 = vpop.f32.mrf.mxu1  ;;  %4162 = vmatprep.mubr.msk.bf16.mxu1 %vm4682_vm5, %v4681_v22  ;;  %4161 = vmatpush3.bf16.xpose.msra.mxu1 %v2104_v55 }
 0x629   : > { %4172 = vmatprep.subr.bf16.mxu1 %v4681_v22  ;;  %v2313_v9 = vsel %vm708_vm4, %v3828_v5, 0 }
 0x62a   : > { %v4129_v10 = vpop.f32.mrf.mxu1 }
 0x62b   : > { %v707_v10 = vld [vmem:[#allocation3] sm:$0xff] }
 0x6db   : > { %v1841_v11 = vpop.f32.mrf.mxu0 }
 0x6dc   : > { %v1985_v26 = vsel %vm708_vm4, %v1841_v11, 0.0  ;;  %v3829_v11 = vld [vmem:[%s4955_s13 + $0x48] sm:$0xf] }
 0x6dd   : > { %v4134_v12 = vpop.f32.mrf.mxu0 }
 0x6de   : > { %v3830_v12 = vld [vmem:[%s4955_s13 + $0x4c] sm:$0xf] }
 0x6df   : > { %v1844_v14 = vpop.f32.mrf.mxu0  ;;  %v1887_v15 = vpop.f32.mrf.mxu1 }
 0x6e0   : > { %v1986_v20 = vsel %vm708_vm4, %v1887_v15, 0.0  ;;  %v2022_v14 = vpack.c.bf16 %v707_v10, %v707_v10  ;;  %v2356_v15 = vsel %vm708_vm4, %v3829_v11, 0 }
 0x6e1   : > { %v4135_v18 = vpop.f32.mrf.mxu0  ;;  %v4140_v19 = vpop.f32.mrf.mxu1  ;;  %v1987_v34 = vadd.f32 %v1986_v20, %v1985_v26  ;;  %v2562_v26 = vsel %vm708_vm4, %v3845_v24, 0 }
 0x6e2   : > { %v2399_v18 = vsel %vm708_vm4, %v3830_v12, 0  ;;  %v3843_v19 = vld [vmem:[%s4955_s13 + $0x50] sm:$0xf] }
 0x6e3   : > { %v1890_v21 = vpop.f32.mrf.mxu1  ;;  %v1933_v23 = vpop.f32.mrf.mxu0  ;;  %v2476_v20 = vsel %vm708_vm4, %v3843_v19, 0  ;;  %v3822_v19 = vld [vmem:[%s4965_s25 + $0xf] ss:$0 sm:$0xff] }
 0x6e4   : > { %v1988_v27 = vsel %vm708_vm4, %v1933_v23, 0.0  ;;  %v3844_v21 = vld [vmem:[%s4955_s13 + $0x54] sm:$0xf] }
 0x6e5   : > { %v4141_v35 = vpop.f32.mrf.mxu1  ;;  %v4146_v36 = vpop.f32.mrf.mxu0  ;;  %v1989_v37 = vadd.f32 %v1988_v27, %v1987_v34  ;;  %v2519_v23 = vsel %vm708_vm4, %v3844_v21, 0  ;;  %v3846_v27 = vld [vmem:[%s4955_s13 + $0x5c] sm:$0xf] }
 0x6e6   : > { %v2605_v34 = vsel %vm708_vm4, %v3846_v27, 0 }
 0x6e7   : > { %v1936_v38 = vpop.f32.mrf.mxu0  ;;  %v1979_v39 = vpop.f32.mrf.mxu1 }
 0x6e8   : > { %v1990_v28 = vsel %vm708_vm4, %v1979_v39, 0.0 }
 0x6e9   : > { %v1991_v16 = vadd.f32 %v1990_v28, %v1989_v37  ;;  %v4147_v41 = vpop.f32.mrf.mxu0  ;;  %v4152_v42 = vpop.f32.mrf.mxu1 }
 0x6eb   : > { %v1996_v43 = vadd.f32 %v1995_v40, %v1991_v16  ;;  %v1982_v17 = vpop.f32.mrf.mxu1 }
 0x6ed   : > { %v4153_v44 = vpop.f32.mrf.mxu1  ;;  %v5193_v45 = vadd.f32 %v1996_v43, %v4981_v13 }
 0x6ef   : > { %v1998_v46 = vsel %vm708_vm4, %v5193_v45, 0.0 }
 0x6f0   : > { %1999 = vadd.xlane.f32.xlu0 %v1998_v46 }
 0x779   : > { %v2000_v47 = vpop.xlane.xlu0 %1999 }
 0x77a   : > { %v2001_v48 = vmul.f32 0.03125, %v2000_v47 }
 0x77c   : > { %v2002_v49 = vsub.f32 %v5193_v45, %v2001_v48 }
 0x77e   : > { %v2003_v50 = vmul.f32 %v2002_v49, %v2002_v49 }
 0x780   : > { %v2004_v51 = vsel %vm708_vm4, %v2003_v50, 0.0  ;;  %v3836_v50 = vld [vmem:[%s4965_s25 + $0x11] ss:$0 sm:$0xff] }
 0x781   : > { %2005 = vadd.xlane.f32.xlu1 %v2004_v51 }
 0x80a   : > { %v2006_v13 = vpop.xlane.xlu1 %2005 }
 0x80b   : > { %v2007_v56 = vmul.f32 0.03125, %v2006_v13 }
 0x80d   : > { %v2008_v57 = vadd.f32 1e-05, %v2007_v56 }
 0x80f   : > { %4460 = vrsqrt.f32 %v2008_v57 }
 0x81c   : > { %v4461_v61 = vpop.eup %4460 }
 0x81d   : > { %v2010_v62 = vmul.f32 %v4461_v61, %v2002_v49  ;;  %v3835_v49 = vld [vmem:[%s4965_s25 + $0x10] ss:$0 sm:$0xff] }
 0x81f   : > { %v2015_v0 = vmul.f32 %v2014_v60, %v2010_v62 }
 0x821   : > { %v2020_v3 = vadd.f32 %v2019_v63, %v2015_v0 }
 0x823   : > { %v2021_v6 = vpack.c.bf16 %v2020_v3, %v2020_v3  ;;  %v3838_v3 = vld [vmem:[%s4965_s25 + $0x13] ss:$0 sm:$0xff] }
 0x825   : > { %4157 = vmatmul.mubr.msk.bf16.vlgmr.msra.gmra.mxu0 %vm708_vm4, %v2021_v6  ;;  %4163 = vmatmul.mubr.msk.bf16.vlgmr.msra.gmra.mxu1 %vm708_vm4, %v2021_v6 }
 0x826   : > { %4167 = vmatpush3.bf16.xpose.msra.mxu0 %v2147_v7  ;;  %4173 = vmatpush3.bf16.xpose.msra.mxu1 %v2190_v4 }
 0x827   : > { %4168 = vmatprep.mubr.msk.bf16.mxu0 %vm4682_vm5, %v4681_v22  ;;  %4174 = vmatprep.mubr.msk.bf16.mxu1 %vm4682_vm5, %v4681_v22 }
 0x828   : > { %4178 = vmatprep.subr.bf16.mxu0 %v4681_v22  ;;  %4184 = vmatprep.subr.bf16.mxu1 %v4681_v22 }
 0x82d   : > { %4169 = vmatmul.mubr.msk.bf16.vlgmr.msra.gmra.mxu0 %vm708_vm4, %v2021_v6  ;;  %4175 = vmatmul.mubr.msk.bf16.vlgmr.msra.gmra.mxu1 %vm708_vm4, %v2021_v6 }
 0x82e   : > { %4179 = vmatpush3.bf16.xpose.msra.mxu0 %v2270_v8  ;;  %4185 = vmatpush3.bf16.xpose.msra.mxu1 %v2313_v9 }
 0x82f   : > { %4180 = vmatprep.mubr.msk.bf16.mxu0 %vm4682_vm5, %v4681_v22  ;;  %4186 = vmatprep.mubr.msk.bf16.mxu1 %vm4682_vm5, %v4681_v22 }
 0x830   : > { %4190 = vmatprep.subr.bf16.mxu0 %v4681_v22  ;;  %4196 = vmatprep.subr.bf16.mxu1 %v4681_v22 }
 0x835   : > { %4181 = vmatmul.mubr.msk.bf16.vlgmr.msra.gmra.mxu0 %vm708_vm4, %v2022_v14  ;;  %4187 = vmatmul.mubr.msk.bf16.vlgmr.msra.gmra.mxu1 %vm708_vm4, %v2022_v14 }
 0x836   : > { %4191 = vmatpush3.bf16.xpose.msra.mxu0 %v2356_v15  ;;  %4197 = vmatpush3.bf16.xpose.msra.mxu1 %v2399_v18  ;;  %v3821_v18 = vld [vmem:[%s4965_s25 + $0xe] ss:$0 sm:$0xff] }
 0x837   : > { %4192 = vmatprep.mubr.msk.bf16.mxu0 %vm4682_vm5, %v4681_v22  ;;  %4198 = vmatprep.mubr.msk.bf16.mxu1 %vm4682_vm5, %v4681_v22 }
 0x838   : > { %4202 = vmatprep.subr.bf16.mxu0 %v4681_v22  ;;  %4208 = vmatprep.subr.bf16.mxu1 %v4681_v22 }
 0x83d   : > { %4193 = vmatmul.mubr.msk.bf16.vlgmr.msra.gmra.mxu0 %vm708_vm4, %v2022_v14  ;;  %4199 = vmatmul.mubr.msk.bf16.vlgmr.msra.gmra.mxu1 %vm708_vm4, %v2022_v14 }
 0x83e   : > { %4204 = vmatprep.mubr.msk.bf16.mxu0 %vm4682_vm5, %v4681_v22  ;;  %4210 = vmatprep.mubr.msk.bf16.mxu1 %vm4682_vm5, %v4681_v22 }
 0x83f   : > { %4203 = vmatpush3.bf16.xpose.msra.mxu0 %v2476_v20  ;;  %4209 = vmatpush3.bf16.xpose.msra.mxu1 %v2519_v23 }
 0x840   : > { %4214 = vmatprep.subr.bf16.mxu0 %v4681_v22  ;;  %4220 = vmatprep.subr.bf16.mxu1 %v4681_v22 }
 0x846   : > { %4205 = vmatmul.mubr.msk.bf16.vlgmr.msra.gmra.mxu0 %vm708_vm4, %v2022_v14  ;;  %4211 = vmatmul.mubr.msk.bf16.vlgmr.msra.gmra.mxu1 %vm708_vm4, %v2022_v14 }
 0x847   : > { %4215 = vmatpush3.bf16.xpose.msra.mxu0 %v2562_v26  ;;  %4216 = vmatprep.mubr.msk.bf16.mxu0 %vm4682_vm5, %v4681_v22 }
 0x848   : > { %4226 = vmatprep.subr.bf16.mxu0 %v4681_v22  ;;  %4221 = vmatpush3.bf16.xpose.msra.mxu1 %v2605_v34 }
 0x849   : > { %4222 = vmatprep.mubr.msk.bf16.mxu1 %vm4682_vm5, %v4681_v22  ;;  %4232 = vmatprep.subr.bf16.mxu1 %v4681_v22 }
 0x84e   : > { %4217 = vmatmul.mubr.msk.bf16.vlgmr.msra.gmra.mxu0 %vm708_vm4, %v2022_v14 }
 0x84f   : > { %4228 = vmatprep.mubr.msk.bf16.mxu0 %vm4682_vm5, %v4681_v22  ;;  %4223 = vmatmul.mubr.msk.bf16.vlgmr.msra.gmra.mxu1 %vm708_vm4, %v2022_v14 }
 0x850   : > { %4234 = vmatprep.mubr.msk.bf16.mxu1 %vm4682_vm5, %v4681_v22 }
 0x8e5   : > { %v2097_v35 = vpop.f32.mrf.mxu0  ;;  %v2140_v36 = vpop.f32.mrf.mxu1 }
 0x8e6   : > { %v2098_v6 = vadd.f32 %v3819_v58, %v2097_v35  ;;  %v2141_v7 = vadd.f32 %v3820_v59, %v2140_v36 }
 0x8e7   : > { %v4158_v37 = vpop.f32.mrf.mxu0  ;;  %v4164_v38 = vpop.f32.mrf.mxu1 }
 0x8e8   : > { %v2647_v11 = vpack.c.bf16 %v2098_v6, %v2098_v6  ;;  %v2648_v12 = vpack.c.bf16 %v2141_v7, %v2141_v7  ;;  %v3851_v38 = vld [vmem:[%s4965_s25 + $0x14] ss:$0 sm:$0xff] }
 0x8e9   : > { %v2100_v39 = vpop.f32.mrf.mxu0  ;;  %v2143_v40 = vpop.f32.mrf.mxu1 }
 0x8ea   : > { %v3852_v40 = vld [vmem:[%s4965_s25 + $0x15] ss:$0 sm:$0xff] }
 0x8eb   : > { %v4159_v28 = vpop.f32.mrf.mxu0  ;;  %v4165_v16 = vpop.f32.mrf.mxu1 }
 0x8ed   : > { %v2183_v41 = vpop.f32.mrf.mxu0  ;;  %v2226_v42 = vpop.f32.mrf.mxu1 }
 0x8ee   : > { %v2184_v34 = vadd.f32 %v3821_v18, %v2183_v41  ;;  %v2227_v35 = vadd.f32 %v3822_v19, %v2226_v42 }
 0x8ef   : > { %v4170_v43 = vpop.f32.mrf.mxu0  ;;  %v4176_v17 = vpop.f32.mrf.mxu1 }
 0x8f0   : > { %v2649_v36 = vpack.c.bf16 %v2184_v34, %v2184_v34  ;;  %v2650_v37 = vpack.c.bf16 %v2227_v35, %v2227_v35 }
 0x8f1   : > { %v2186_v44 = vpop.f32.mrf.mxu0  ;;  %v2229_v46 = vpop.f32.mrf.mxu1 }
 0x8f3   : > { %v4171_v47 = vpop.f32.mrf.mxu0  ;;  %v4177_v48 = vpop.f32.mrf.mxu1 }
 0x8f5   : > { %v2306_v51 = vpop.f32.mrf.mxu0  ;;  %v2349_v52 = vpop.f32.mrf.mxu1 }
 0x8f6   : > { %v2307_v53 = vadd.f32 %v3835_v49, %v2306_v51  ;;  %v2350_v54 = vadd.f32 %v3836_v50, %v2349_v52 }
 0x8f7   : > { %v4182_v55 = vpop.f32.mrf.mxu0  ;;  %v4188_v13 = vpop.f32.mrf.mxu1 }
 0x8f8   : > { %v2651_v56 = vpack.c.bf16 %v2307_v53, %v2307_v53  ;;  %v2652_v57 = vpack.c.bf16 %v2350_v54, %v2350_v54 }
 0x8f9   : > { %v2309_v60 = vpop.f32.mrf.mxu0  ;;  %v2352_v61 = vpop.f32.mrf.mxu1 }
 0x8fa   : > { %v2659_v62 = vsel %vm1361_vm6, %v2651_v56, 0  ;;  %v2705_v63 = vsel %vm1361_vm6, %v2652_v57, 0 }
 0x8fb   : > { %v4183_v0 = vpop.f32.mrf.mxu0  ;;  %v4189_v1 = vpop.f32.mrf.mxu1  ;;  %4227 = vmatpush3.bf16.xpose.msra.mxu0 %v2659_v62  ;;  %4233 = vmatpush3.bf16.xpose.msra.mxu1 %v2705_v63 }
 0x8fc   : > { %4238 = vmatprep.subr.bf16.mxu0 %v4681_v22  ;;  %4244 = vmatprep.subr.bf16.mxu1 %v4681_v22 }
 0x8fd   : > { %v2392_v4 = vpop.f32.mrf.mxu0  ;;  %v2435_v31 = vpop.f32.mrf.mxu1 }
 0x8fe   : > { %v2393_v5 = vadd.f32 %v3837_v2, %v2392_v4  ;;  %v2436_v8 = vadd.f32 %v3838_v3, %v2435_v31 }
 0x8ff   : > { %v4194_v9 = vpop.f32.mrf.mxu0  ;;  %v4200_v10 = vpop.f32.mrf.mxu1 }
 0x900   : > { %v2653_v14 = vpack.c.bf16 %v2393_v5, %v2393_v5  ;;  %v2654_v15 = vpack.c.bf16 %v2436_v8, %v2436_v8 }
 0x901   : > { %v2395_v20 = vpop.f32.mrf.mxu0  ;;  %v2438_v21 = vpop.f32.mrf.mxu1 }
 0x902   : > { %v2751_v23 = vsel %vm1361_vm6, %v2653_v14, 0  ;;  %v2797_v24 = vsel %vm1361_vm6, %v2654_v15, 0  ;;  %4229 = vmatmul.mubr.msk.bf16.vlgmr.msra.gmra.mxu0 %vm1361_vm6, %v2647_v11  ;;  %4235 = vmatmul.mubr.msk.bf16.vlgmr.msra.gmra.mxu1 %vm1361_vm6, %v2648_v12 }
 0x903   : > { %v4195_v26 = vpop.f32.mrf.mxu0  ;;  %v4201_v27 = vpop.f32.mrf.mxu1  ;;  %4239 = vmatpush3.bf16.xpose.msra.mxu0 %v2751_v23  ;;  %4245 = vmatpush3.bf16.xpose.msra.mxu1 %v2797_v24 }
 0x904   : > { %4240 = vmatprep.mubr.msk.bf16.mxu0 %vm4682_vm5, %v4681_v22  ;;  %4246 = vmatprep.mubr.msk.bf16.mxu1 %vm4682_vm5, %v4681_v22 }
 0x905   : > { %4250 = vmatprep.subr.bf16.mxu0 %v4681_v22  ;;  %4256 = vmatprep.subr.bf16.mxu1 %v4681_v22 }
 0x906   : > { %v2512_v39 = vpop.f32.mrf.mxu0  ;;  %v2555_v41 = vpop.f32.mrf.mxu1 }
 0x907   : > { %v2513_v28 = vadd.f32 %v3851_v38, %v2512_v39  ;;  %v2556_v43 = vadd.f32 %v3852_v40, %v2555_v41 }
 0x908   : > { %v4206_v16 = vpop.f32.mrf.mxu0  ;;  %v4212_v44 = vpop.f32.mrf.mxu1 }
 0x909   : > { %v2895_v42 = vpack.c.bf16 %v2513_v28, %v2513_v28  ;;  %v2896_v47 = vpack.c.bf16 %v2556_v43, %v2556_v43 }
 0x90a   : > { %4241 = vmatmul.mubr.msk.bf16.vlgmr.msra.gmra.mxu0 %vm1361_vm6, %v2649_v36  ;;  %4247 = vmatmul.mubr.msk.bf16.vlgmr.msra.gmra.mxu1 %vm1361_vm6, %v2650_v37  ;;  %v2515_v17 = vpop.f32.mrf.mxu0  ;;  %v2558_v49 = vpop.f32.mrf.mxu1 }
 0x90b   : > { %4252 = vmatprep.mubr.msk.bf16.mxu0 %vm4682_vm5, %v4681_v22  ;;  %4258 = vmatprep.mubr.msk.bf16.mxu1 %vm4682_vm5, %v4681_v22  ;;  %v2903_v46 = vsel %vm1611_vm7, %v2895_v42, 0  ;;  %v2949_v50 = vsel %vm1611_vm7, %v2896_v47, 0 }
 0x90c   : > { %v4207_v48 = vpop.f32.mrf.mxu0  ;;  %4251 = vmatpush3.bf16.msra.mxu0 %v2903_v46  ;;  %v4213_v51 = vpop.f32.mrf.mxu1  ;;  %4257 = vmatpush3.bf16.msra.mxu1 %v2949_v50 }
 0x90d   : > { %4262 = vmatprep.subr.bf16.mxu0 %v4681_v22  ;;  %4268 = vmatprep.subr.bf16.mxu1 %v4681_v22 }
 0x90e   : > { %v5308_v52 = vpop.f32.mrf.mxu0 }
 0x90f   : > { %v5311_v54 = vpop.f32.mrf.mxu1 }
 0x910   : > { %v4218_v53 = vpop.f32.mrf.mxu0 }
 0x911   : > { %v4224_v13 = vpop.f32.mrf.mxu1  ;;  %v3853_v53 = vld [vmem:[%s4965_s25 + $0x16] ss:$0 sm:$0xff] }
 0x912   : > { %v2601_v55 = vpop.f32.mrf.mxu0  ;;  %v3854_v13 = vld [vmem:[%s4965_s25 + $0x17] ss:$0 sm:$0xff] }
 0x913   : > { %v2644_v57 = vpop.f32.mrf.mxu1 }
 0x914   : > { %v4219_v56 = vpop.f32.mrf.mxu0  ;;  %v2599_v57 = vadd.f32 %v3853_v53, %v5308_v52 }
 0x915   : > { %v4225_v58 = vpop.f32.mrf.mxu1 }
 0x916   : > { %v2642_v58 = vadd.f32 %v3854_v13, %v5311_v54  ;;  %v3867_v54 = vld [vmem:[%s4960_s26 + $0x10] sm:$0xf] }
 0x9c2   : > { %v2695_v59 = vpop.f32.mrf.mxu0  ;;  %v2741_v60 = vpop.f32.mrf.mxu1 }
 0x9c3   : > { %v2839_v61 = vmul.f32 0.35355338, %v2695_v59  ;;  %v2840_v62 = vmul.f32 0.35355338, %v2741_v60 }
 0x9c4   : > { %v4230_v63 = vpop.f32.mrf.mxu0  ;;  %v4236_v0 = vpop.f32.mrf.mxu1 }
 0x9c5   : > { %v2843_v1 = vsel %vm5122_vm8, -1e+30, %v2839_v61  ;;  %v2844_v2 = vsel %vm5122_vm8, -1e+30, %v2840_v62  ;;  %v2897_v61 = vpack.c.bf16 %v2599_v57, %v2599_v57  ;;  %v2898_v63 = vpack.c.bf16 %v2642_v58, %v2642_v58 }
 0x9c6   : > { %v2698_v3 = vpop.f32.mrf.mxu0  ;;  %v2744_v6 = vpop.f32.mrf.mxu1  ;;  %v2847_v7 = vsel %vm1361_vm6, %v2843_v1, -inf  ;;  %v2850_v4 = vsel %vm1361_vm6, %v2844_v2, -inf }
 0x9c7   : > { %2848 = vmax.xlane.f32.xlu0 %v2847_v7  ;;  %2851 = vmax.xlane.f32.xlu1 %v2850_v4  ;;  %v2995_v3 = vsel %vm1611_vm7, %v2897_v61, 0  ;;  %v3041_v6 = vsel %vm1611_vm7, %v2898_v63, 0  ;;  %v4480_v61 = vld [vmem:[%s4932_s15] sm:$0xff] }
 0x9c8   : > { %v4231_v31 = vpop.f32.mrf.mxu0  ;;  %v4237_v5 = vpop.f32.mrf.mxu1 }
 0x9c9   : > { %v3868_v31 = vld [vmem:[%s4960_s26 + $0x14] sm:$0xf] }
 0x9ca   : > { %v2787_v8 = vpop.f32.mrf.mxu0  ;;  %v2833_v9 = vpop.f32.mrf.mxu1 }
 0x9cb   : > { %v2841_v10 = vmul.f32 0.35355338, %v2787_v8  ;;  %v2842_v11 = vmul.f32 0.35355338, %v2833_v9  ;;  %v3096_v9 = vsel %vm1611_vm7, %v3867_v54, 0 }
 0x9cc   : > { %v4242_v12 = vpop.f32.mrf.mxu0  ;;  %v4248_v14 = vpop.f32.mrf.mxu1 }
 0x9cd   : > { %v2845_v15 = vsel %vm5122_vm8, -1e+30, %v2841_v10  ;;  %v2846_v18 = vsel %vm5122_vm8, -1e+30, %v2842_v11  ;;  %v3142_v11 = vsel %vm1611_vm7, %v3868_v31, 0 }
 0x9ce   : > { %v2790_v19 = vpop.f32.mrf.mxu0  ;;  %v2836_v20 = vpop.f32.mrf.mxu1  ;;  %v2853_v21 = vsel %vm1361_vm6, %v2845_v15, -inf  ;;  %v2856_v23 = vsel %vm1361_vm6, %v2846_v18, -inf  ;;  %v3869_v12 = vld [vmem:[%s4960_s26 + $0x18] sm:$0xf]  ;;  %v3870_v14 = vld [vmem:[%s4960_s26 + $0x1c] sm:$0xf] }
 0x9cf   : > { %2854 = vmax.xlane.f32.xlu0 %v2853_v21  ;;  %2857 = vmax.xlane.f32.xlu1 %v2856_v23  ;;  %v3188_v20 = vsel %vm1611_vm7, %v3869_v12, 0  ;;  %s5493_s26 = scalar_lea.vmem [#allocation6], %s4924_s21 }
 0x9d0   : > { %v4243_v24 = vpop.f32.mrf.mxu0  ;;  %v4249_v26 = vpop.f32.mrf.mxu1  ;;  %v4436_v12 = vld [vmem:[%s5493_s26 + $0x8] sm:$0xff]   ;;  %s5494_s16 = smov %s5493_s26 }
 0x9d1   : > { %v3234_v24 = vsel %vm1611_vm7, %v3870_v14, 0  ;;  %v4437_v14 = vld [vmem:[%s5494_s16] sm:$0xff]  }
 0xa50   : > { %v2849_v27 = vpop.xlane.xlu0 %2848  ;;  %v2852_v34 = vpop.xlane.xlu1 %2851 }
 0xa51   : > { %v2859_v35 = vsub.f32 %v2843_v1, %v2849_v27  ;;  %v2860_v36 = vsub.f32 %v2844_v2, %v2852_v34 }
 0xa53   : > { %v2863_v37 = vmul.f32 1.442695, %v2859_v35  ;;  %v2865_v38 = vmul.f32 1.442695, %v2860_v36 }
 0xa55   : > { %4462 = vpow2.f32 %v2863_v37 }
 0xa56   : > { %4464 = vpow2.f32 %v2865_v38 }
 0xa58   : > { %v2855_v33 = vpop.xlane.xlu0 %2854  ;;  %v2858_v39 = vpop.xlane.xlu1 %2857 }
 0xa59   : > { %v2861_v40 = vsub.f32 %v2845_v15, %v2855_v33  ;;  %v2862_v28 = vsub.f32 %v2846_v18, %v2858_v39 }
 0xa5b   : > { %v2867_v16 = vmul.f32 1.442695, %v2861_v40  ;;  %v2869_v41 = vmul.f32 1.442695, %v2862_v28 }
 0xa5d   : > { %4466 = vpow2.f32 %v2867_v16 }
 0xa5e   : > { %4468 = vpow2.f32 %v2869_v41 }
 0xa62   : > { %v4463_v42 = vpop.eup %4462 }
 0xa63   : > { %v4465_v43 = vpop.eup %4464  ;;  %v2871_v17 = vsel %vm1361_vm6, %v4463_v42, 0.0 }
 0xa64   : > { %2872 = vadd.xlane.f32.xlu0 %v2871_v17  ;;  %v2874_v44 = vsel %vm1361_vm6, %v4465_v43, 0.0 }
 0xa65   : > { %2875 = vadd.xlane.f32.xlu1 %v2874_v44 }
 0xa6a   : > { %v4467_v46 = vpop.eup %4466 }
 0xa6b   : > { %v4469_v47 = vpop.eup %4468  ;;  %v2877_v48 = vsel %vm1361_vm6, %v4467_v46, 0.0 }
 0xa6c   : > { %2878 = vadd.xlane.f32.xlu0 %v2877_v48  ;;  %v2880_v49 = vsel %vm1361_vm6, %v4469_v47, 0.0 }
 0xa6d   : > { %2881 = vadd.xlane.f32.xlu1 %v2880_v49 }
 0xaed   : > { %v2873_v50 = vpop.xlane.xlu0 %2872 }
 0xaee   : > { %4470 = vrcp.f32 %v2873_v50  ;;  %v2876_v51 = vpop.xlane.xlu1 %2875 }
 0xaef   : > { %4472 = vrcp.f32 %v2876_v51 }
 0xaf5   : > { %v2879_v55 = vpop.xlane.xlu0 %2878 }
 0xaf6   : > { %4474 = vrcp.f32 %v2879_v55  ;;  %v2882_v56 = vpop.xlane.xlu1 %2881  ;;  %v3285_v55 = vsub.s32 7, %v5000_v29 }
 0xaf7   : > { %4476 = vrcp.f32 %v2882_v56 }
 0xafb   : > { %v4471_v59 = vpop.eup %4470 }
 0xafc   : > { %v4473_v60 = vpop.eup %4472  ;;  %v2887_v62 = vmul.f32 %v4471_v59, %v4463_v42 }
 0xafd   : > { %v2888_v0 = vmul.f32 %v4473_v60, %v4465_v43 }
 0xafe   : > { %v2891_v1 = vpack.c.bf16 %v2887_v62, %v2887_v62  ;;  %v3286_v62 = vrot.slane %v4480_v61, %v3285_v55 }
 0xaff   : > { %v2892_v2 = vpack.c.bf16 %v2888_v0, %v2888_v0 }
 0xb00   : > { %4253 = vmatmul.mubr.msk.bf16.vlgmr.msra.gmra.mxu0 %vm1361_vm6, %v2891_v1 }
 0xb01   : > { %4259 = vmatmul.mubr.msk.bf16.vlgmr.msra.gmra.mxu1 %vm1361_vm6, %v2892_v2  ;;  %4263 = vmatpush3.bf16.msra.mxu0 %v2995_v3 }
 0xb02   : > { %4269 = vmatpush3.bf16.msra.mxu1 %v3041_v6  ;;  %4264 = vmatprep.mubr.msk.bf16.mxu0 %vm4682_vm5, %v4681_v22 }
 0xb03   : > { %v4475_v52 = vpop.eup %4474  ;;  %4270 = vmatprep.mubr.msk.bf16.mxu1 %vm4682_vm5, %v4681_v22  ;;  %4274 = vmatprep.subr.bf16.mxu0 %v4681_v22 }
 0xb04   : > { %v4477_v7 = vpop.eup %4476  ;;  %v2889_v4 = vmul.f32 %v4475_v52, %v4467_v46  ;;  %4280 = vmatprep.subr.bf16.mxu1 %v4681_v22 }
 0xb05   : > { %v2890_v5 = vmul.f32 %v4477_v7, %v4469_v47 }
 0xb06   : > { %v2893_v8 = vpack.c.bf16 %v2889_v4, %v2889_v4 }
 0xb07   : > { %v2894_v10 = vpack.c.bf16 %v2890_v5, %v2890_v5 }
 0xb08   : > { %4265 = vmatmul.mubr.msk.bf16.vlgmr.msra.gmra.mxu0 %vm1361_vm6, %v2893_v8 }
 0xb09   : > { %4271 = vmatmul.mubr.msk.bf16.vlgmr.msra.gmra.mxu1 %vm1361_vm6, %v2894_v10  ;;  %4275 = vmatpush3.bf16.msra.mxu0 %v3096_v9 }
 0xb0a   : > { %4281 = vmatpush3.bf16.msra.mxu1 %v3142_v11  ;;  %4276 = vmatprep.mubr.msk.bf16.mxu0 %vm4682_vm5, %v4681_v22 }
 0xb0b   : > { %4282 = vmatprep.mubr.msk.bf16.mxu1 %vm4682_vm5, %v4681_v22  ;;  %4286 = vmatprep.subr.bf16.mxu0 %v4681_v22 }
 0xb0c   : > { %4292 = vmatprep.subr.bf16.mxu1 %v4681_v22 }
 0xbc0   : > { %v2939_v15 = vpop.f32.mrf.mxu0 }
 0xbc1   : > { %v3088_v18 = vpack.c.bf16 %v2939_v15, %v2939_v15  ;;  %v2985_v19 = vpop.f32.mrf.mxu1  ;;  %v4439_v15 = vld [vmem:[%s4970_s3 + $0x10] sm:$0xff]  }
 0xbc2   : > { %v3089_v21 = vpack.c.bf16 %v2985_v19, %v2985_v19  ;;  %v4254_v23 = vpop.f32.mrf.mxu0 }
 0xbc3   : > { %v4260_v26 = vpop.f32.mrf.mxu1  ;;  %4277 = vmatmul.mubr.msk.bf16.vlgmr.msra.gmra.mxu0 %vm1361_vm6, %v3088_v18  ;;  %v3309_v23 = vsub.s32 5, %v5000_v29 }
 0xbc4   : > { %4283 = vmatmul.mubr.msk.bf16.vlgmr.msra.gmra.mxu1 %vm1361_vm6, %v3089_v21  ;;  %v2942_v27 = vpop.f32.mrf.mxu0  ;;  %4287 = vmatpush3.bf16.msra.mxu0 %v3188_v20  ;;  %v3304_v21 = vsub.s32 4, %v5000_v29 }
 0xbc5   : > { %v2988_v34 = vpop.f32.mrf.mxu1  ;;  %4293 = vmatpush3.bf16.msra.mxu1 %v3234_v24  ;;  %4288 = vmatprep.mubr.msk.bf16.mxu0 %vm4682_vm5, %v4681_v22 }
 0xbc6   : > { %v4255_v35 = vpop.f32.mrf.mxu0  ;;  %4294 = vmatprep.mubr.msk.bf16.mxu1 %vm4682_vm5, %v4681_v22  ;;  %4298 = vmatprep.subr.bf16.mxu0 %v4681_v22  ;;  %v3305_v24 = vrot.slane %v4480_v61, %v3304_v21  ;;  %v3310_v34 = vrot.slane %v4480_v61, %v3309_v23 }
 0xbc7   : > { %v4261_v36 = vpop.f32.mrf.mxu1  ;;  %4306 = vmatprep.subr.bf16.mxu1 %v4681_v22 }
 0xbc8   : > { %v3031_v37 = vpop.f32.mrf.mxu0 }
 0xbc9   : > { %v3090_v38 = vpack.c.bf16 %v3031_v37, %v3031_v37  ;;  %v3077_v33 = vpop.f32.mrf.mxu1 }
 0xbca   : > { %v3091_v39 = vpack.c.bf16 %v3077_v33, %v3077_v33  ;;  %v4266_v40 = vpop.f32.mrf.mxu0  ;;  %v4441_v33 = vld [vmem:[%s4970_s3] sm:$0xff]  }
 0xbcb   : > { %v4272_v28 = vpop.f32.mrf.mxu1  ;;  %4289 = vmatmul.mubr.msk.bf16.vlgmr.msra.gmra.mxu0 %vm1361_vm6, %v3090_v38  ;;  %v4440_v38 = vld [vmem:[%s4970_s3 + $0x8] sm:$0xff]  }
 0xbcc   : > { %4295 = vmatmul.mubr.msk.bf16.vlgmr.msra.gmra.mxu1 %vm1361_vm6, %v3091_v39  ;;  %v3034_v16 = vpop.f32.mrf.mxu0  ;;  %4302 = vmatprep.mubr.msk.bf16.mxu0 %vm4682_vm5, %v4681_v22  ;;  %v705_v39 = vld [vmem:[%s4932_s15 + $0x8] sm:$0xff]  ;;  %s5495_s15 = sld [smem:[#allocation25_spill]] (!%p3883_p1) }
 0xbcd   : > { %v3080_v41 = vpop.f32.mrf.mxu1  ;;  %4314 = vmatprep.mubr.msk.bf16.mxu1 %vm4682_vm5, %v4681_v22  ;;  %4299 = vmatpush3.bf16.msra.mxu0 %v4436_v12  ;;  %v3320_v40 = vrot.slane %v705_v39, %v725_v30 }
 0xbce   : > { %v4267_v42 = vpop.f32.mrf.mxu0  ;;  %4300 = vmatprep.subr.bf16.mxu0 %v4681_v22 }
 0xbcf   : > { %v4273_v43 = vpop.f32.mrf.mxu1 }
 0xbd1   : > { %4301 = vmatpush3.bf16.msra.mxu0 %v4437_v14 }
 0xc83   : > { %v3132_v17 = vpop.f32.mrf.mxu0 }
 0xc84   : > { %v3178_v44 = vpop.f32.mrf.mxu1  ;;  %v3276_v49 = vsel %vm708_vm4, %v3132_v17, 0.0 }
 0xc85   : > { %v4278_v46 = vpop.f32.mrf.mxu0  ;;  %v3277_v50 = vsel %vm708_vm4, %v3178_v44, 0.0 }
 0xc86   : > { %v4284_v47 = vpop.f32.mrf.mxu1  ;;  %v3278_v56 = vadd.f32 %v3277_v50, %v3276_v49  ;;  %v3458_v46 = vrot.slane %v705_v39, %v730_v32 }
 0xc87   : > { %v3135_v48 = vpop.f32.mrf.mxu0 }
 0xc88   : > { %v3181_v51 = vpop.f32.mrf.mxu1 }
 0xc89   : > { %v4279_v53 = vpop.f32.mrf.mxu0 }
 0xc8a   : > { %v4285_v13 = vpop.f32.mrf.mxu1 }
 0xc8b   : > { %v3224_v57 = vpop.f32.mrf.mxu0 }
 0xc8c   : > { %v3279_v58 = vsel %vm708_vm4, %v3224_v57, 0.0  ;;  %v3270_v59 = vpop.f32.mrf.mxu1 }
 0xc8d   : > { %v3280_v60 = vadd.f32 %v3279_v58, %v3278_v56  ;;  %v4290_v63 = vpop.f32.mrf.mxu0  ;;  %v3281_v0 = vsel %vm708_vm4, %v3270_v59, 0.0 }
 0xc8e   : > { %v4296_v1 = vpop.f32.mrf.mxu1 }
 0xc8f   : > { %v3282_v2 = vadd.f32 %v3281_v0, %v3280_v60  ;;  %v3227_v3 = vpop.f32.mrf.mxu0 }
 0xc90   : > { %v3273_v6 = vpop.f32.mrf.mxu1 }
 0xc91   : > { %v3287_v52 = vadd.f32 %v3286_v62, %v3282_v2  ;;  %v4291_v54 = vpop.f32.mrf.mxu0 }
 0xc92   : > { %v4297_v7 = vpop.f32.mrf.mxu1 }
 0xc93   : > { %v3288_v4 = vadd.f32 %v3287_v52, %v5193_v45  ;;  %v4438_v45 = vld [vmem:[%s4970_s3 + $0x18] sm:$0xff]  }
 0xc94   : > { %4307 = vmatpush3.bf16.msra.mxu1 %v4438_v45 }
 0xc95   : > { %v3289_v31 = vsel %vm708_vm4, %v3288_v4, 0.0  ;;  %4308 = vmatprep.subr.bf16.mxu1 %v4681_v22 }
 0xc96   : > { %3290 = vadd.xlane.f32.xlu0 %v3289_v31 }
 0xc98   : > { %4309 = vmatpush3.bf16.msra.mxu1 %v4439_v15 }
 0xc99   : > { %4310 = vmatprep.subr.bf16.mxu1 %v4681_v22 }
 0xc9c   : > { %4311 = vmatpush3.bf16.msra.mxu1 %v4440_v38 }
 0xc9d   : > { %4312 = vmatprep.subr.bf16.mxu1 %v4681_v22 }
 0xca0   : > { %4313 = vmatpush3.bf16.msra.mxu1 %v4441_v33 }
 0xd1f   : > { %v3291_v5 = vpop.xlane.xlu0 %3290 }
 0xd20   : > { %v3292_v8 = vmul.f32 0.03125, %v3291_v5 }
 0xd22   : > { %v3293_v9 = vsub.f32 %v3288_v4, %v3292_v8 }
 0xd24   : > { %v3294_v10 = vmul.f32 %v3293_v9, %v3293_v9 }
 0xd26   : > { %v3295_v11 = vsel %vm708_vm4, %v3294_v10, 0.0 }
 0xd27   : > { %3296 = vadd.xlane.f32.xlu1 %v3295_v11 }
 0xdb0   : > { %v3297_v18 = vpop.xlane.xlu1 %3296 }
 0xdb1   : > { %v3298_v19 = vmul.f32 0.03125, %v3297_v18 }
 0xdb3   : > { %v3299_v20 = vadd.f32 1e-05, %v3298_v19 }
 0xdb5   : > { %4478 = vrsqrt.f32 %v3299_v20 }
 0xdc2   : > { %v4479_v26 = vpop.eup %4478 }
 0xdc3   : > { %v3301_v27 = vmul.f32 %v4479_v26, %v3293_v9 }
 0xdc5   : > { %v3306_v35 = vmul.f32 %v3305_v24, %v3301_v27 }
 0xdc7   : > { %v3311_v36 = vadd.f32 %v3310_v34, %v3306_v35 }
 0xdc9   : > { %v3312_v37 = vpack.c.bf16 %v3311_v36, %v3311_v36 }
 0xdcb   : > { %4303 = vmatmul.mubr.msk.bf16.vlgmr.msra.gmra.mxu0 %vm708_vm4, %v3312_v37 }
 0xe8b   : > { %v3370_v28 = vpop.f32.mrf.mxu0 }
 0xe8c   : > { %v3371_v16 = vadd.f32 %v3370_v28, %v3320_v40 }
 0xe8d   : > { %v4304_v41 = vpop.f32.mrf.mxu0 }
 0xe8e   : > { %v3376_v42 = vmax.f32 %v3371_v16, 0.0 }
 0xe8f   : > { %v3373_v43 = vpop.f32.mrf.mxu0 }
 0xe90   : > { %v3377_v17 = vpack.c.bf16 %v3376_v42, %v3376_v42 }
 0xe91   : > { %v4305_v44 = vpop.f32.mrf.mxu0 }
 0xe92   : > { %4315 = vmatmul.mubr.msk.bf16.vlgmr.msra.gmra.mxu1 %vm3410_vm9, %v3377_v17 }
 0xf52   : > { %v3448_v47 = vpop.f32.mrf.mxu1 }
 0xf53   : > { %v3454_v22 = vadd.f32 %v3448_v47, %v3288_v4 }
 0xf54   : > { %v4316_v48 = vpop.f32.mrf.mxu1  ;;  %3464 = sbr.rel (%p3883_p1) target bundleno = 4167 (0x1047), region = 92 }
 0xf55   : > { %v3459_v49 = vadd.f32 %v3458_v46, %v3454_v22 }
 0xf56   : > { %v3451_v50 = vpop.f32.mrf.mxu1 }
 0xf57   : > { %3460 = vst.msk [vmem:[#allocation2] sm:$0xff] %vm708_vm4, %v3459_v49 }
 0xf58   : > { %v4317_v30 = vpop.f32.mrf.mxu1 }
 0xf59   : > { %v4481_v51 = vld [vmem:[#allocation9 + $0x8] sm:$0xff]   ;;  %v4683_v53 = vmov 0.0   ;;  %v4482_v55 = vld [vmem:[#allocation9] sm:$0xff]   ;;  %vm4684_vm10 = vmmov 0   ;;  %v3465_v29 = vpack.c.bf16 %v3459_v49, %v3459_v49  ;;  %vm3532_vm11 = vcmp.ge.s32.totalorder %v5118_v25, 7 }
 0xf5a   : > { %4318 = vmatprep.subr.bf16.mxu0 %v4683_v53  ;;  %4322 = vmatprep.mubr.msk.bf16.mxu0 %vm4684_vm10, %v4683_v53  ;;  %v3884_v32 = vld [vmem:[%s5495_s15] ss:$0 sm:$0xff]  ;;  %vm3533_vm12 = vcmp.lt.s32.totalorder %v5118_v25, 8 }
 0xf5b   : > { %4319 = vmatpush3.bf16.msra.mxu0 %v4481_v51  ;;  %vm3534_vm13 = vmand %vm3532_vm11, %vm3533_vm12 }
 0xf5c   : > { %4320 = vmatprep.subr.bf16.mxu0 %v4683_v53 }
 0xf5f   : > { %4321 = vmatpush3.bf16.msra.mxu0 %v4482_v55 }
 0xf62   : > { %4323 = vmatmul.mubr.msk.bf16.vlgmr.msra.gmra.mxu0 %vm708_vm4, %v3465_v29 }
0x1022   : > { %v3526_v13 = vpop.f32.mrf.mxu0 }
0x1023   : > { %v3527_v56 = vadd.f32 %v3884_v32, %v3526_v13 }
0x1024   : > { %v4324_v57 = vpop.f32.mrf.mxu0 }
0x1025   : > { %v3888_v58 = vmul.f32 -1.442695, %v3527_v56 }
0x1026   : > { %v3529_v59 = vpop.f32.mrf.mxu0 }
0x1027   : > { %4483 = vpow2.f32 %v3888_v58 }
0x1028   : > { %v4325_v60 = vpop.f32.mrf.mxu0 }
0x1034   : > { %v4484_v61 = vpop.eup %4483 }
0x1035   : > { %v3538_v62 = vadd.f32 1.0, %v4484_v61 }
0x1037   : > { %4485 = vrcp.f32 %v3538_v62 }
0x1044   : > { %v4486_v63 = vpop.eup %4485 }
0x1045   : > { %v3541_v0 = vsel %vm3534_vm13, %v4486_v63, %v3527_v56 }
0x1046   : > { %3542 = vst [vmem:[%s4975_s7] sm:$0xff] %v3541_v0 }
0x1047 PF: > { %s27_s28 = sadd.s32 1, %s4669_s28   ;;  %s5496_s24 = sld [smem:[#allocation18_spill]] }
0x1048   : > { %p24_p8 = scmp.ge.s32.totalorder %s27_s28, 6   ;;  %s5497_s27 = sld [smem:[#allocation14_spill]] }
0x1049   : > { %s5498_s25 = sld [smem:[#allocation15_spill]]  ;;  %s5501_s21 = smov %s4645_s22 }
0x104a   : > { %s5499_s26 = sld [smem:[#allocation16_spill]]  ;;  %s5502_s22 = smov %s4649_s23 }
0x104b   : > { %s5500_s18 = sld [smem:[#allocation17_spill]] }
0x104d   : > { %s5503_s23 = smov %s5496_s24  ;;  %26 = sbr.rel (!%p24_p8) target bundleno = 16 (0x10), region = 165 }
0x104e   : > { %s5504_s24 = smov %s5497_s27 }
0x1051   : > { %s5505_s27 = smov %s5500_s18 }
0x1052   :  { %3562 = vsyncpa [#allocation5], 1 }
0x1053   :  { %3564 = vsyncpa [#allocation5 + $0x1], 1 }
0x1054   :  { %3565 = vsyncpa [#allocation7], 1 }
0x1055   :  { %3567 = vsyncpa [#allocation7 + $0x1], 1 }
0x1056   :  { %3568 = vsyncpa [#allocation10], 1 }

</bundles_post_ra>
